<compile_context>
chip_gen: v7x
topology: tpu7x:2x2x1
jax: 0.10.0
libtpu: 0.0.40
codegen_flags: <defaults>
</compile_context>

<pallas_src>
import functools

import jax
import jax.numpy as jnp
from jax.experimental import pallas as pl
from jax.experimental.pallas import tpu as pltpu


# ---------------------------------------------------------------------------
# Helpers
# ---------------------------------------------------------------------------
def _relu(x):
    return jnp.maximum(x, 0.0)


def _round_up(x, m):
    return ((x + m - 1) // m) * m


# ---------------------------------------------------------------------------
# Pallas kernel: one grid step == one tile of B_TILE batch elements.
# ---------------------------------------------------------------------------
def _decomposable_attention_kernel(
    Sa,                                              # static: premise length
    ab_ref,                                          # (Bt, Sa+Sb, E)  bf16
    wf1_ref, bf1_ref, wf2_ref, bf2_ref,              # attend MLP f
    wg1a_ref, wg1b_ref, bg1_ref, wg2_ref, bg2_ref,   # compare MLP g (W1 split)
    wh1a_ref, wh1b_ref, bh1_ref, wh2_ref, bh2_ref,   # aggregate MLP h (W1 split)
    wo_ref, bo_ref,                                  # final Linear(Hp, Op)
    o_ref,                                           # (Bt, Op) lane-dense block
):
    f32, bf16 = jnp.float32, jnp.bfloat16
    Bt, S, E = ab_ref.shape
    Hp = wf1_ref.shape[1]

    AB = ab_ref[...]                        # (Bt, S, E) bf16, S = Sa + Sb
    X = AB.reshape(Bt * S, E)               # flat [A|B] rows; no concat copy

    # ---- Attend f (shared weights): one large-M matmul pair over all rows ----
    fX = _relu(jnp.dot(X, wf1_ref[...], preferred_element_type=f32) + bf1_ref[...])
    fX = _relu(jnp.dot(fX.astype(bf16), wf2_ref[...], preferred_element_type=f32)
               + bf2_ref[...])
    fX3 = fX.reshape(Bt, S, Hp)             # f32: Sa split stays sublane-aligned
    fA = fX3[:, :Sa, :].astype(bf16)        # (Bt, Sa, Hp)
    fB = fX3[:, Sa:, :].astype(bf16)        # (Bt, Sb, Hp)

    # ---- Scores + row/column softmax sharing ONE max and ONE exp over e ------
    e = jax.lax.dot_general(fA, fB, (((2,), (2,)), ((0,), (0,))),
                            preferred_element_type=f32)         # (Bt, Sa, Sb)
    m = jnp.max(jnp.max(e, axis=2, keepdims=True), axis=1, keepdims=True)
    P = jnp.exp(e - m)
    # approx reciprocal (~1e-3 rel) is intentional: EUP slot, off the VALU path.
    p_row = (P * pl.reciprocal(jnp.sum(P, axis=2, keepdims=True), approx=True)
             ).astype(bf16)                                      # softmax over Sb
    p_col = (P * pl.reciprocal(jnp.sum(P, axis=1, keepdims=True), approx=True)
             ).astype(bf16)                                      # softmax over Sa

    A = AB[:, :Sa, :]
    B = AB[:, Sa:, :]
    beta = jax.lax.dot_general(p_row, B, (((2,), (1,)), ((0,), (0,))),
                               preferred_element_type=f32)       # (Bt, Sa, E)
    alpha = jax.lax.dot_general(p_col, A, (((1,), (1,)), ((0,), (0,))),
                                preferred_element_type=f32)      # (Bt, Sb, E)

    # ---- Compare g: split first-layer weight => no feature concat; the
    # sequence-axis join of beta/alpha is done in bf16 (half the copy bytes). --
    Y = jnp.concatenate([beta.astype(bf16), alpha.astype(bf16)],
                        axis=1).reshape(Bt * S, E)
    v = _relu(jnp.dot(X, wg1a_ref[...], preferred_element_type=f32)
              + jnp.dot(Y, wg1b_ref[...], preferred_element_type=f32)
              + bg1_ref[...])
    v = _relu(jnp.dot(v.astype(bf16), wg2_ref[...], preferred_element_type=f32)
              + bg2_ref[...])
    v3 = v.reshape(Bt, S, Hp)

    # ---- Aggregate h: sequence sums, split first-layer weight, final linear --
    sA = jnp.sum(v3[:, :Sa, :], axis=1).astype(bf16)             # (Bt, Hp)
    sB = jnp.sum(v3[:, Sa:, :], axis=1).astype(bf16)             # (Bt, Hp)
    h = _relu(jnp.dot(sA, wh1a_ref[...], preferred_element_type=f32)
              + jnp.dot(sB, wh1b_ref[...], preferred_element_type=f32)
              + bh1_ref[...])
    h = _relu(jnp.dot(h.astype(bf16), wh2_ref[...], preferred_element_type=f32)
              + bh2_ref[...])
    y = jnp.dot(h.astype(bf16), wo_ref[...], preferred_element_type=f32) + bo_ref[...]

    o_ref[...] = y.astype(o_ref.dtype)      # lane-dense (Bt, 128*k) store


# ---------------------------------------------------------------------------
# Wrapper
# ---------------------------------------------------------------------------
def _vmem_limit_bytes():
    cap = 64 * 1024 * 1024                  # conservative default (v7x per-TC)
    try:
        info = pltpu.get_tpu_info()
        cap = int(getattr(info, "vmem_capacity_bytes", cap) or cap)
    except Exception:
        pass
    # leave headroom for compiler temporaries; 64 MiB is plenty on v5e/v6e too
    return int(min(cap * 3 // 4, 64 * 1024 * 1024))


def _choose_b_tile(batch, Sa, Sb, E, Hp, budget_bytes):
    """Largest batch tile per grid step within a conservative VMEM budget that
    also feeds the flattened token-wise matmuls ~2k rows of M per step."""
    S = Sa + Sb
    per_b = (
        S * E * 2 * 2                    # AB input tile bf16, double-buffered
        + S * E * (2 + 2)                # A/B slice views + Y join (bf16)
        + S * E * 4                      # beta/alpha accumulators (f32)
        + S * Hp * (4 + 2 + 4)           # fX (f32), fA/fB (bf16), v (f32)
        + Sa * Sb * (4 + 4 + 2 + 2)      # e, P, p_row, p_col
    )
    fit = max(1, budget_bytes // max(per_b, 1))
    target = max(1, pl.cdiv(2048, S))    # ~2048 flattened rows per grid step
    bt = int(min(batch, fit, target))
    if bt >= batch:
        return batch                     # single tile: block == full array dim
    # Multi-tile: the out/in block sublane dim must be a multiple of 8.  If the
    # VMEM-derived fit is < 8 we still take 8 (the budget above is conservative).
    bt = max(8, (min(bt, fit) // 8) * 8)
    # Prefer an even number of tiles so a 2-TensorCore part (v7x) splits the
    # "parallel" batch axis evenly across cores.
    n = pl.cdiv(batch, bt)
    if n > 1 and n % 2 == 1:
        bt_up = _round_up(pl.cdiv(batch, n + 1), 8)
        if bt_up <= max(fit, 8) and pl.cdiv(batch, bt_up) % 2 == 0:
            bt = bt_up
    return bt


def _prep_weights(params, E, Hp, Op):
    """Zero-pad hidden/logit widths to lane-dense multiples of 128 (inert through
    ReLU and downstream matmuls); matrices in bf16, biases in f32."""
    f32, bf16 = jnp.float32, jnp.bfloat16

    def mat(w, rows, cols):
        w = w.astype(f32)
        w = jnp.pad(w, ((0, rows - w.shape[0]), (0, cols - w.shape[1])))
        return w.astype(bf16)

    def bias(b, cols):
        b = b.astype(f32).reshape(1, -1)
        return jnp.pad(b, ((0, 0), (0, cols - b.shape[1])))

    return [
        mat(params["wf1"], E, Hp), bias(params["bf1"], Hp),
        mat(params["wf2"], Hp, Hp), bias(params["bf2"], Hp),
        mat(params["wg1a"], E, Hp), mat(params["wg1b"], E, Hp), bias(params["bg1"], Hp),
        mat(params["wg2"], Hp, Hp), bias(params["bg2"], Hp),
        mat(params["wh1a"], Hp, Hp), mat(params["wh1b"], Hp, Hp), bias(params["bh1"], Hp),
        mat(params["wh2"], Hp, Hp), bias(params["bh2"], Hp),
        mat(params["wo"], Hp, Op), bias(params["bo"], Op),
    ]


def decomposable_attention_forward(premises, hypotheses, params, b_tile=None):
    """premises/hypotheses: int32 (batch, Sa)/(batch, Sb). Returns (batch, 3) f32."""
    bf16 = jnp.bfloat16
    batch, Sa = premises.shape
    _, Sb = hypotheses.shape
    E = params["embedding"].shape[1]
    H = params["wf1"].shape[1]
    O = params["wo"].shape[1]
    Hp = _round_up(H, 128)     # lane-dense hidden width (zero padding is inert)
    Op = _round_up(O, 128)     # lane-dense logits: avoids masked partial stores
    S = Sa + Sb

    # Embedding gather (bf16 table => half the gathered HBM bytes) directly into
    # the sequence-concatenated [A | B] layout, so no activation concat is ever
    # materialized on either side of the kernel boundary.
    # TODO(synk): a further HBM round-trip could be removed by gathering rows
    # inside the kernel (scalar-prefetched token ids + per-row DMA from an HBM
    # embedding ref); deferred because per-token DMAs at small E are descriptor-
    # overhead bound and the table does not generally fit in VMEM.
    emb = params["embedding"].astype(bf16)
    tokens = jnp.concatenate([premises, hypotheses], axis=1)       # (batch, S)
    AB = jnp.take(emb, tokens, axis=0)                             # (batch, S, E)

    weights = _prep_weights(params, E, Hp, Op)
    weight_bytes = sum(int(w.size) * w.dtype.itemsize for w in weights)

    vmem_limit = _vmem_limit_bytes()
    # Weight blocks are grid-invariant but still double-buffered by the pipeline.
    # TODO(synk): at production E/H, single-buffer them (pipeline_mode=
    # pl.Buffered(1)) to reclaim that VMEM for a larger batch tile.
    budget = max(4 * 1024 * 1024, int(vmem_limit * 0.6) - 2 * weight_bytes)
    if b_tile is None:
        b_tile = _choose_b_tile(batch, Sa, Sb, E, Hp, budget)
    n_tiles = pl.cdiv(batch, b_tile)
    padded = n_tiles * b_tile
    if padded != batch:
        AB = jnp.pad(AB, ((0, padded - batch), (0, 0), (0, 0)))

    in_specs = [pl.BlockSpec((b_tile, S, E), lambda i: (i, 0, 0))] + [
        pl.BlockSpec(w.shape, lambda i: (0, 0)) for w in weights
    ]

    kernel = functools.partial(_decomposable_attention_kernel, Sa)
    out = pl.pallas_call(
        kernel,
        out_shape=jax.ShapeDtypeStruct((padded, Op), jnp.float32),
        grid=(n_tiles,),
        in_specs=in_specs,
        out_specs=pl.BlockSpec((b_tile, Op), lambda i: (i, 0)),
        compiler_params=pltpu.CompilerParams(
            dimension_semantics=("parallel",),
            vmem_limit_bytes=vmem_limit,
        ),
    )(AB, *weights)
    return out[:batch, :O]


# ---------------------------------------------------------------------------
# Pure-JAX reference (mirrors the PyTorch forward in eval mode, f32)
# ---------------------------------------------------------------------------
def reference_forward(premises, hypotheses, params):
    emb = params["embedding"]
    A = jnp.take(emb, premises, axis=0)
    B = jnp.take(emb, hypotheses, axis=0)

    def mlp2(x, w1, b1, w2, b2):
        x = jnp.maximum(x @ w1 + b1, 0.0)
        return jnp.maximum(x @ w2 + b2, 0.0)

    wg1 = jnp.concatenate([params["wg1a"], params["wg1b"]], axis=0)
    wh1 = jnp.concatenate([params["wh1a"], params["wh1b"]], axis=0)

    fA = mlp2(A, params["wf1"], params["bf1"], params["wf2"], params["bf2"])
    fB = mlp2(B, params["wf1"], params["bf1"], params["wf2"], params["bf2"])
    e = jnp.einsum("bij,bkj->bik", fA, fB)
    beta = jnp.einsum("bik,bkd->bid", jax.nn.softmax(e, axis=-1), B)
    alpha = jnp.einsum("bik,bkd->bid",
                       jax.nn.softmax(jnp.swapaxes(e, 1, 2), axis=-1), A)

    V_A = mlp2(jnp.concatenate([A, beta], axis=2), wg1, params["bg1"],
               params["wg2"], params["bg2"])
    V_B = mlp2(jnp.concatenate([B, alpha], axis=2), wg1, params["bg1"],
               params["wg2"], params["bg2"])

    sA = V_A.sum(axis=1)
    sB = V_B.sum(axis=1)
    h = mlp2(jnp.concatenate([sA, sB], axis=1), wh1, params["bh1"],
             params["wh2"], params["bh2"])
    return h @ params["wo"] + params["bo"]


# ---------------------------------------------------------------------------
# Deterministic parameter construction
# ---------------------------------------------------------------------------
def make_params(key, vocab_size, embed_size, num_hiddens, num_outputs=3):
    E, H = embed_size, num_hiddens
    ks = jax.random.split(key, 16)

    def w(k, shape, scale=0.1):
        return (scale * jax.random.normal(k, shape)).astype(jnp.float32)

    params = {
        "embedding": w(ks[0], (vocab_size, E), 1.0),
        # Attend MLP f: Linear(E,H) -> ReLU -> Linear(H,H) -> ReLU
        "wf1": w(ks[1], (E, H)), "bf1": w(ks[2], (1, H)),
        "wf2": w(ks[3], (H, H)), "bf2": w(ks[4], (1, H)),
        # Compare MLP g: Linear(2E,H) first layer split into [A-part, beta-part]
        "wg1a": w(ks[5], (E, H)), "wg1b": w(ks[6], (E, H)), "bg1": w(ks[7], (1, H)),
        "wg2": w(ks[8], (H, H)), "bg2": w(ks[9], (1, H)),
        # Aggregate MLP h: Linear(2H,H) first layer split into [V_A-part, V_B-part]
        "wh1a": w(ks[10], (H, H)), "wh1b": w(ks[11], (H, H)), "bh1": w(ks[12], (1, H)),
        "wh2": w(ks[13], (H, H)), "bh2": w(ks[14], (1, H)),
        # Final Linear(H, 3)
        "wo": w(ks[15], (H, num_outputs)), "bo": jnp.zeros((1, num_outputs), jnp.float32),
    }
    return params


if __name__ == "__main__":
    vocab_size = 50
    embed_size = 32
    num_hiddens = 32
    seq = 8

    key = jax.random.PRNGKey(0)
    kp, kh, kw = jax.random.split(key, 3)
    params = make_params(kw, vocab_size, embed_size, num_hiddens)

    # Small shapes consistent with the module spec (single-tile path).
    batch = 2
    premises = jax.random.randint(kp, (batch, seq), 0, vocab_size, dtype=jnp.int32)
    hypotheses = jax.random.randint(kh, (batch, seq), 0, vocab_size, dtype=jnp.int32)

    y = decomposable_attention_forward(premises, hypotheses, params)
    y = jax.block_until_ready(y)
    y_ref = reference_forward(premises, hypotheses, params)
    assert y.shape == (batch, 3)
    # bf16 matmul operands + approx reciprocal => relaxed tolerance vs f32 ref.
    assert jnp.allclose(y, y_ref, atol=5e-2, rtol=5e-2), (y, y_ref)

    # Also exercise the multi-tile (batch-padded, parallel-grid) path.
    batch2 = 20
    kp2, kh2 = jax.random.split(jax.random.PRNGKey(1), 2)
    prem2 = jax.random.randint(kp2, (batch2, seq), 0, vocab_size, dtype=jnp.int32)
    hyp2 = jax.random.randint(kh2, (batch2, seq), 0, vocab_size, dtype=jnp.int32)
    y2 = jax.block_until_ready(
        decomposable_attention_forward(prem2, hyp2, params, b_tile=8))
    y2_ref = reference_forward(prem2, hyp2, params)
    assert y2.shape == (batch2, 3)
    assert jnp.allclose(y2, y2_ref, atol=5e-2, rtol=5e-2), (y2, y2_ref)

    print("KERNEL_OK")
</pallas_src>

<mosaic_0001>
module attributes {stable_mosaic.version = 11 : i64} {
  func.func @_decomposable_attention_kernel(%arg0: i32, %arg1: memref<2x16x32xbf16, #tpu.memory_space<vmem>>, %arg2: memref<32x128xbf16, #tpu.memory_space<vmem>>, %arg3: memref<1x128xf32, #tpu.memory_space<vmem>>, %arg4: memref<128x128xbf16, #tpu.memory_space<vmem>>, %arg5: memref<1x128xf32, #tpu.memory_space<vmem>>, %arg6: memref<32x128xbf16, #tpu.memory_space<vmem>>, %arg7: memref<32x128xbf16, #tpu.memory_space<vmem>>, %arg8: memref<1x128xf32, #tpu.memory_space<vmem>>, %arg9: memref<128x128xbf16, #tpu.memory_space<vmem>>, %arg10: memref<1x128xf32, #tpu.memory_space<vmem>>, %arg11: memref<128x128xbf16, #tpu.memory_space<vmem>>, %arg12: memref<128x128xbf16, #tpu.memory_space<vmem>>, %arg13: memref<1x128xf32, #tpu.memory_space<vmem>>, %arg14: memref<128x128xbf16, #tpu.memory_space<vmem>>, %arg15: memref<1x128xf32, #tpu.memory_space<vmem>>, %arg16: memref<128x128xbf16, #tpu.memory_space<vmem>>, %arg17: memref<1x128xf32, #tpu.memory_space<vmem>>, %arg18: memref<2x128xf32, #tpu.memory_space<vmem>>) attributes {dimension_semantics = [#tpu.dimension_semantics<parallel>], iteration_bounds = array<i64: 1>, scalar_prefetch = 0 : i64, scratch_operands = 0 : i64, tpu.core_type = #tpu.core_type<tc>, window_params = [{transform_indices = @transform_0, window_bounds = array<i64: 2, 16, 32>}, {pipeline_mode = #tpu.pipeline_mode<synchronous>, transform_indices = @transform_1, window_bounds = array<i64: 32, 128>}, {pipeline_mode = #tpu.pipeline_mode<synchronous>, transform_indices = @transform_2, window_bounds = array<i64: 1, 128>}, {pipeline_mode = #tpu.pipeline_mode<synchronous>, transform_indices = @transform_3, window_bounds = array<i64: 128, 128>}, {pipeline_mode = #tpu.pipeline_mode<synchronous>, transform_indices = @transform_4, window_bounds = array<i64: 1, 128>}, {pipeline_mode = #tpu.pipeline_mode<synchronous>, transform_indices = @transform_5, window_bounds = array<i64: 32, 128>}, {pipeline_mode = #tpu.pipeline_mode<synchronous>, transform_indices = @transform_6, window_bounds = array<i64: 32, 128>}, {pipeline_mode = #tpu.pipeline_mode<synchronous>, transform_indices = @transform_7, window_bounds = array<i64: 1, 128>}, {pipeline_mode = #tpu.pipeline_mode<synchronous>, transform_indices = @transform_8, window_bounds = array<i64: 128, 128>}, {pipeline_mode = #tpu.pipeline_mode<synchronous>, transform_indices = @transform_9, window_bounds = array<i64: 1, 128>}, {pipeline_mode = #tpu.pipeline_mode<synchronous>, transform_indices = @transform_10, window_bounds = array<i64: 128, 128>}, {pipeline_mode = #tpu.pipeline_mode<synchronous>, transform_indices = @transform_11, window_bounds = array<i64: 128, 128>}, {pipeline_mode = #tpu.pipeline_mode<synchronous>, transform_indices = @transform_12, window_bounds = array<i64: 1, 128>}, {pipeline_mode = #tpu.pipeline_mode<synchronous>, transform_indices = @transform_13, window_bounds = array<i64: 128, 128>}, {pipeline_mode = #tpu.pipeline_mode<synchronous>, transform_indices = @transform_14, window_bounds = array<i64: 1, 128>}, {pipeline_mode = #tpu.pipeline_mode<synchronous>, transform_indices = @transform_15, window_bounds = array<i64: 128, 128>}, {pipeline_mode = #tpu.pipeline_mode<synchronous>, transform_indices = @transform_16, window_bounds = array<i64: 1, 128>}, {transform_indices = @transform_17, window_bounds = array<i64: 2, 128>}]} {
    %c0 = arith.constant 0 : index
    %c0_0 = arith.constant 0 : index
    %c0_1 = arith.constant 0 : index
    %0 = vector.load %arg1[%c0, %c0_0, %c0_1] : memref<2x16x32xbf16, #tpu.memory_space<vmem>>, vector<2x16x32xbf16>
    %1 = vector.shape_cast %0 : vector<2x16x32xbf16> to vector<32x32xbf16>
    %c0_2 = arith.constant 0 : index
    %c0_3 = arith.constant 0 : index
    %2 = vector.load %arg2[%c0_2, %c0_3] : memref<32x128xbf16, #tpu.memory_space<vmem>>, vector<32x128xbf16>
    %cst = arith.constant dense<0.000000e+00> : vector<32x128xf32>
    %3 = tpu.matmul %1, %2, %cst {dimension_numbers = #tpu.dot_dimension_numbers<[1], [0], [0], [1], [0, 0, 1, 1], [], []>} : vector<32x32xbf16>, vector<32x128xbf16>, vector<32x128xf32> -> vector<32x128xf32>
    %c0_4 = arith.constant 0 : index
    %c0_5 = arith.constant 0 : index
    %4 = vector.load %arg3[%c0_4, %c0_5] : memref<1x128xf32, #tpu.memory_space<vmem>>, vector<1x128xf32>
    %5 = vector.broadcast %4 : vector<1x128xf32> to vector<32x128xf32>
    %6 = arith.addf %3, %5 : vector<32x128xf32>
    %cst_6 = arith.constant 0.000000e+00 : f32
    %7 = vector.broadcast %cst_6 : f32 to vector<32x128xf32>
    %8 = arith.maximumf %6, %7 : vector<32x128xf32>
    %9 = arith.truncf %8 : vector<32x128xf32> to vector<32x128xbf16>
    %c0_7 = arith.constant 0 : index
    %c0_8 = arith.constant 0 : index
    %10 = vector.load %arg4[%c0_7, %c0_8] : memref<128x128xbf16, #tpu.memory_space<vmem>>, vector<128x128xbf16>
    %cst_9 = arith.constant dense<0.000000e+00> : vector<32x128xf32>
    %11 = tpu.matmul %9, %10, %cst_9 {dimension_numbers = #tpu.dot_dimension_numbers<[1], [0], [0], [1], [0, 0, 1, 1], [], []>} : vector<32x128xbf16>, vector<128x128xbf16>, vector<32x128xf32> -> vector<32x128xf32>
    %c0_10 = arith.constant 0 : index
    %c0_11 = arith.constant 0 : index
    %12 = vector.load %arg5[%c0_10, %c0_11] : memref<1x128xf32, #tpu.memory_space<vmem>>, vector<1x128xf32>
    %13 = vector.broadcast %12 : vector<1x128xf32> to vector<32x128xf32>
    %14 = arith.addf %11, %13 : vector<32x128xf32>
    %cst_12 = arith.constant 0.000000e+00 : f32
    %15 = vector.broadcast %cst_12 : f32 to vector<32x128xf32>
    %16 = arith.maximumf %14, %15 : vector<32x128xf32>
    %17 = vector.shape_cast %16 : vector<32x128xf32> to vector<2x16x128xf32>
    %18 = vector.extract_strided_slice %17 {offsets = [0, 0, 0], sizes = [2, 8, 128], strides = [1, 1, 1]} : vector<2x16x128xf32> to vector<2x8x128xf32>
    %19 = arith.truncf %18 : vector<2x8x128xf32> to vector<2x8x128xbf16>
    %20 = vector.extract_strided_slice %17 {offsets = [0, 8, 0], sizes = [2, 8, 128], strides = [1, 1, 1]} : vector<2x16x128xf32> to vector<2x8x128xf32>
    %21 = arith.truncf %20 : vector<2x8x128xf32> to vector<2x8x128xbf16>
    %cst_13 = arith.constant dense<0.000000e+00> : vector<2x8x8xf32>
    %22 = tpu.matmul %19, %21, %cst_13 {dimension_numbers = #tpu.dot_dimension_numbers<[2], [2], [1], [1], [0, 0, 0, 1, 1, 1], [0], [0]>} : vector<2x8x128xbf16>, vector<2x8x128xbf16>, vector<2x8x8xf32> -> vector<2x8x8xf32>
    %cst_14 = arith.constant dense<0xFF800000> : vector<2x8xf32>
    %23 = vector.multi_reduction <maximumf>, %22, %cst_14 [2] : vector<2x8x8xf32> to vector<2x8xf32>
    %24 = vector.shape_cast %23 : vector<2x8xf32> to vector<2x8x1xf32>
    %cst_15 = arith.constant dense<0xFF800000> : vector<2x1xf32>
    %25 = vector.multi_reduction <maximumf>, %24, %cst_15 [1] : vector<2x8x1xf32> to vector<2x1xf32>
    %26 = vector.shape_cast %25 : vector<2x1xf32> to vector<2x1x1xf32>
    %27 = vector.broadcast %26 : vector<2x1x1xf32> to vector<2x8x8xf32>
    %28 = arith.subf %22, %27 : vector<2x8x8xf32>
    %29 = math.exp %28 : vector<2x8x8xf32>
    %cst_16 = arith.constant dense<0.000000e+00> : vector<2x8xf32>
    %30 = vector.multi_reduction <add>, %29, %cst_16 [2] : vector<2x8x8xf32> to vector<2x8xf32>
    %31 = vector.shape_cast %30 : vector<2x8xf32> to vector<2x8x1xf32>
    %32 = tpu.reciprocal %31 {approx = true} : vector<2x8x1xf32> -> vector<2x8x1xf32>
    %33 = vector.broadcast %32 : vector<2x8x1xf32> to vector<2x8x8xf32>
    %34 = arith.mulf %29, %33 : vector<2x8x8xf32>
    %35 = arith.truncf %34 : vector<2x8x8xf32> to vector<2x8x8xbf16>
    %cst_17 = arith.constant dense<0.000000e+00> : vector<2x8xf32>
    %36 = vector.multi_reduction <add>, %29, %cst_17 [1] : vector<2x8x8xf32> to vector<2x8xf32>
    %37 = vector.shape_cast %36 : vector<2x8xf32> to vector<2x1x8xf32>
    %38 = tpu.reciprocal %37 {approx = true} : vector<2x1x8xf32> -> vector<2x1x8xf32>
    %39 = vector.broadcast %38 : vector<2x1x8xf32> to vector<2x8x8xf32>
    %40 = arith.mulf %29, %39 : vector<2x8x8xf32>
    %41 = arith.truncf %40 : vector<2x8x8xf32> to vector<2x8x8xbf16>
    %42 = vector.extract_strided_slice %0 {offsets = [0, 0, 0], sizes = [2, 8, 32], strides = [1, 1, 1]} : vector<2x16x32xbf16> to vector<2x8x32xbf16>
    %43 = vector.extract_strided_slice %0 {offsets = [0, 8, 0], sizes = [2, 8, 32], strides = [1, 1, 1]} : vector<2x16x32xbf16> to vector<2x8x32xbf16>
    %cst_18 = arith.constant dense<0.000000e+00> : vector<2x8x32xf32>
    %44 = tpu.matmul %35, %43, %cst_18 {dimension_numbers = #tpu.dot_dimension_numbers<[2], [1], [1], [2], [0, 0, 0, 1, 1, 2], [0], [0]>} : vector<2x8x8xbf16>, vector<2x8x32xbf16>, vector<2x8x32xf32> -> vector<2x8x32xf32>
    %cst_19 = arith.constant dense<0.000000e+00> : vector<2x8x32xf32>
    %45 = tpu.matmul %41, %42, %cst_19 {dimension_numbers = #tpu.dot_dimension_numbers<[1], [1], [2], [2], [0, 0, 0, 2, 1, 2], [0], [0]>} : vector<2x8x8xbf16>, vector<2x8x32xbf16>, vector<2x8x32xf32> -> vector<2x8x32xf32>
    %46 = arith.truncf %44 : vector<2x8x32xf32> to vector<2x8x32xbf16>
    %47 = arith.truncf %45 : vector<2x8x32xf32> to vector<2x8x32xbf16>
    %48 = tpu.concatenate %46, %47 in 1 : vector<2x8x32xbf16>, vector<2x8x32xbf16> -> vector<2x16x32xbf16>
    %49 = vector.shape_cast %48 : vector<2x16x32xbf16> to vector<32x32xbf16>
    %c0_20 = arith.constant 0 : index
    %c0_21 = arith.constant 0 : index
    %50 = vector.load %arg6[%c0_20, %c0_21] : memref<32x128xbf16, #tpu.memory_space<vmem>>, vector<32x128xbf16>
    %cst_22 = arith.constant dense<0.000000e+00> : vector<32x128xf32>
    %51 = tpu.matmul %1, %50, %cst_22 {dimension_numbers = #tpu.dot_dimension_numbers<[1], [0], [0], [1], [0, 0, 1, 1], [], []>} : vector<32x32xbf16>, vector<32x128xbf16>, vector<32x128xf32> -> vector<32x128xf32>
    %c0_23 = arith.constant 0 : index
    %c0_24 = arith.constant 0 : index
    %52 = vector.load %arg7[%c0_23, %c0_24] : memref<32x128xbf16, #tpu.memory_space<vmem>>, vector<32x128xbf16>
    %cst_25 = arith.constant dense<0.000000e+00> : vector<32x128xf32>
    %53 = tpu.matmul %49, %52, %cst_25 {dimension_numbers = #tpu.dot_dimension_numbers<[1], [0], [0], [1], [0, 0, 1, 1], [], []>} : vector<32x32xbf16>, vector<32x128xbf16>, vector<32x128xf32> -> vector<32x128xf32>
    %54 = arith.addf %51, %53 : vector<32x128xf32>
    %c0_26 = arith.constant 0 : index
    %c0_27 = arith.constant 0 : index
    %55 = vector.load %arg8[%c0_26, %c0_27] : memref<1x128xf32, #tpu.memory_space<vmem>>, vector<1x128xf32>
    %56 = vector.broadcast %55 : vector<1x128xf32> to vector<32x128xf32>
    %57 = arith.addf %54, %56 : vector<32x128xf32>
    %cst_28 = arith.constant 0.000000e+00 : f32
    %58 = vector.broadcast %cst_28 : f32 to vector<32x128xf32>
    %59 = arith.maximumf %57, %58 : vector<32x128xf32>
    %60 = arith.truncf %59 : vector<32x128xf32> to vector<32x128xbf16>
    %c0_29 = arith.constant 0 : index
    %c0_30 = arith.constant 0 : index
    %61 = vector.load %arg9[%c0_29, %c0_30] : memref<128x128xbf16, #tpu.memory_space<vmem>>, vector<128x128xbf16>
    %cst_31 = arith.constant dense<0.000000e+00> : vector<32x128xf32>
    %62 = tpu.matmul %60, %61, %cst_31 {dimension_numbers = #tpu.dot_dimension_numbers<[1], [0], [0], [1], [0, 0, 1, 1], [], []>} : vector<32x128xbf16>, vector<128x128xbf16>, vector<32x128xf32> -> vector<32x128xf32>
    %c0_32 = arith.constant 0 : index
    %c0_33 = arith.constant 0 : index
    %63 = vector.load %arg10[%c0_32, %c0_33] : memref<1x128xf32, #tpu.memory_space<vmem>>, vector<1x128xf32>
    %64 = vector.broadcast %63 : vector<1x128xf32> to vector<32x128xf32>
    %65 = arith.addf %62, %64 : vector<32x128xf32>
    %cst_34 = arith.constant 0.000000e+00 : f32
    %66 = vector.broadcast %cst_34 : f32 to vector<32x128xf32>
    %67 = arith.maximumf %65, %66 : vector<32x128xf32>
    %68 = vector.shape_cast %67 : vector<32x128xf32> to vector<2x16x128xf32>
    %69 = vector.extract_strided_slice %68 {offsets = [0, 0, 0], sizes = [2, 8, 128], strides = [1, 1, 1]} : vector<2x16x128xf32> to vector<2x8x128xf32>
    %cst_35 = arith.constant dense<0.000000e+00> : vector<2x128xf32>
    %70 = vector.multi_reduction <add>, %69, %cst_35 [1] : vector<2x8x128xf32> to vector<2x128xf32>
    %71 = arith.truncf %70 : vector<2x128xf32> to vector<2x128xbf16>
    %72 = vector.extract_strided_slice %68 {offsets = [0, 8, 0], sizes = [2, 8, 128], strides = [1, 1, 1]} : vector<2x16x128xf32> to vector<2x8x128xf32>
    %cst_36 = arith.constant dense<0.000000e+00> : vector<2x128xf32>
    %73 = vector.multi_reduction <add>, %72, %cst_36 [1] : vector<2x8x128xf32> to vector<2x128xf32>
    %74 = arith.truncf %73 : vector<2x128xf32> to vector<2x128xbf16>
    %c0_37 = arith.constant 0 : index
    %c0_38 = arith.constant 0 : index
    %75 = vector.load %arg11[%c0_37, %c0_38] : memref<128x128xbf16, #tpu.memory_space<vmem>>, vector<128x128xbf16>
    %cst_39 = arith.constant dense<0.000000e+00> : vector<2x128xf32>
    %76 = tpu.matmul %71, %75, %cst_39 {dimension_numbers = #tpu.dot_dimension_numbers<[1], [0], [0], [1], [0, 0, 1, 1], [], []>} : vector<2x128xbf16>, vector<128x128xbf16>, vector<2x128xf32> -> vector<2x128xf32>
    %c0_40 = arith.constant 0 : index
    %c0_41 = arith.constant 0 : index
    %77 = vector.load %arg12[%c0_40, %c0_41] : memref<128x128xbf16, #tpu.memory_space<vmem>>, vector<128x128xbf16>
    %cst_42 = arith.constant dense<0.000000e+00> : vector<2x128xf32>
    %78 = tpu.matmul %74, %77, %cst_42 {dimension_numbers = #tpu.dot_dimension_numbers<[1], [0], [0], [1], [0, 0, 1, 1], [], []>} : vector<2x128xbf16>, vector<128x128xbf16>, vector<2x128xf32> -> vector<2x128xf32>
    %79 = arith.addf %76, %78 : vector<2x128xf32>
    %c0_43 = arith.constant 0 : index
    %c0_44 = arith.constant 0 : index
    %80 = vector.load %arg13[%c0_43, %c0_44] : memref<1x128xf32, #tpu.memory_space<vmem>>, vector<1x128xf32>
    %81 = vector.broadcast %80 : vector<1x128xf32> to vector<2x128xf32>
    %82 = arith.addf %79, %81 : vector<2x128xf32>
    %cst_45 = arith.constant 0.000000e+00 : f32
    %83 = vector.broadcast %cst_45 : f32 to vector<2x128xf32>
    %84 = arith.maximumf %82, %83 : vector<2x128xf32>
    %85 = arith.truncf %84 : vector<2x128xf32> to vector<2x128xbf16>
    %c0_46 = arith.constant 0 : index
    %c0_47 = arith.constant 0 : index
    %86 = vector.load %arg14[%c0_46, %c0_47] : memref<128x128xbf16, #tpu.memory_space<vmem>>, vector<128x128xbf16>
    %cst_48 = arith.constant dense<0.000000e+00> : vector<2x128xf32>
    %87 = tpu.matmul %85, %86, %cst_48 {dimension_numbers = #tpu.dot_dimension_numbers<[1], [0], [0], [1], [0, 0, 1, 1], [], []>} : vector<2x128xbf16>, vector<128x128xbf16>, vector<2x128xf32> -> vector<2x128xf32>
    %c0_49 = arith.constant 0 : index
    %c0_50 = arith.constant 0 : index
    %88 = vector.load %arg15[%c0_49, %c0_50] : memref<1x128xf32, #tpu.memory_space<vmem>>, vector<1x128xf32>
    %89 = vector.broadcast %88 : vector<1x128xf32> to vector<2x128xf32>
    %90 = arith.addf %87, %89 : vector<2x128xf32>
    %cst_51 = arith.constant 0.000000e+00 : f32
    %91 = vector.broadcast %cst_51 : f32 to vector<2x128xf32>
    %92 = arith.maximumf %90, %91 : vector<2x128xf32>
    %93 = arith.truncf %92 : vector<2x128xf32> to vector<2x128xbf16>
    %c0_52 = arith.constant 0 : index
    %c0_53 = arith.constant 0 : index
    %94 = vector.load %arg16[%c0_52, %c0_53] : memref<128x128xbf16, #tpu.memory_space<vmem>>, vector<128x128xbf16>
    %cst_54 = arith.constant dense<0.000000e+00> : vector<2x128xf32>
    %95 = tpu.matmul %93, %94, %cst_54 {dimension_numbers = #tpu.dot_dimension_numbers<[1], [0], [0], [1], [0, 0, 1, 1], [], []>} : vector<2x128xbf16>, vector<128x128xbf16>, vector<2x128xf32> -> vector<2x128xf32>
    %c0_55 = arith.constant 0 : index
    %c0_56 = arith.constant 0 : index
    %96 = vector.load %arg17[%c0_55, %c0_56] : memref<1x128xf32, #tpu.memory_space<vmem>>, vector<1x128xf32>
    %97 = vector.broadcast %96 : vector<1x128xf32> to vector<2x128xf32>
    %98 = arith.addf %95, %97 : vector<2x128xf32>
    %c0_57 = arith.constant 0 : index
    %c0_58 = arith.constant 0 : index
    %99 = vector.load %arg18[%c0_57, %c0_58] : memref<2x128xf32, #tpu.memory_space<vmem>>, vector<2x128xf32>
    tpu.vector_store %arg18[%c0_57, %c0_58], %98 {strides = array<i32>} : memref<2x128xf32, #tpu.memory_space<vmem>>, vector<2x128xf32>,
    return
  }
  func.func @transform_0(%arg0: i32) -> (i32, i32, i32) {
    %c0_i32 = arith.constant 0 : i32
    %c0_i32_0 = arith.constant 0 : i32
    %c0_i32_1 = arith.constant 0 : i32
    return %arg0, %c0_i32, %c0_i32_0 : i32, i32, i32
  }
  func.func @transform_1(%arg0: i32) -> (i32, i32) {
    %c0_i32 = arith.constant 0 : i32
    %c0_i32_0 = arith.constant 0 : i32
    %c0_i32_1 = arith.constant 0 : i32
    return %c0_i32, %c0_i32_0 : i32, i32
  }
  func.func @transform_2(%arg0: i32) -> (i32, i32) {
    %c0_i32 = arith.constant 0 : i32
    %c0_i32_0 = arith.constant 0 : i32
    %c0_i32_1 = arith.constant 0 : i32
    return %c0_i32, %c0_i32_0 : i32, i32
  }
  func.func @transform_3(%arg0: i32) -> (i32, i32) {
    %c0_i32 = arith.constant 0 : i32
    %c0_i32_0 = arith.constant 0 : i32
    %c0_i32_1 = arith.constant 0 : i32
    return %c0_i32, %c0_i32_0 : i32, i32
  }
  func.func @transform_4(%arg0: i32) -> (i32, i32) {
    %c0_i32 = arith.constant 0 : i32
    %c0_i32_0 = arith.constant 0 : i32
    %c0_i32_1 = arith.constant 0 : i32
    return %c0_i32, %c0_i32_0 : i32, i32
  }
  func.func @transform_5(%arg0: i32) -> (i32, i32) {
    %c0_i32 = arith.constant 0 : i32
    %c0_i32_0 = arith.constant 0 : i32
    %c0_i32_1 = arith.constant 0 : i32
    return %c0_i32, %c0_i32_0 : i32, i32
  }
  func.func @transform_6(%arg0: i32) -> (i32, i32) {
    %c0_i32 = arith.constant 0 : i32
    %c0_i32_0 = arith.constant 0 : i32
    %c0_i32_1 = arith.constant 0 : i32
    return %c0_i32, %c0_i32_0 : i32, i32
  }
  func.func @transform_7(%arg0: i32) -> (i32, i32) {
    %c0_i32 = arith.constant 0 : i32
    %c0_i32_0 = arith.constant 0 : i32
    %c0_i32_1 = arith.constant 0 : i32
    return %c0_i32, %c0_i32_0 : i32, i32
  }
  func.func @transform_8(%arg0: i32) -> (i32, i32) {
    %c0_i32 = arith.constant 0 : i32
    %c0_i32_0 = arith.constant 0 : i32
    %c0_i32_1 = arith.constant 0 : i32
    return %c0_i32, %c0_i32_0 : i32, i32
  }
  func.func @transform_9(%arg0: i32) -> (i32, i32) {
    %c0_i32 = arith.constant 0 : i32
    %c0_i32_0 = arith.constant 0 : i32
    %c0_i32_1 = arith.constant 0 : i32
    return %c0_i32, %c0_i32_0 : i32, i32
  }
  func.func @transform_10(%arg0: i32) -> (i32, i32) {
    %c0_i32 = arith.constant 0 : i32
    %c0_i32_0 = arith.constant 0 : i32
    %c0_i32_1 = arith.constant 0 : i32
    return %c0_i32, %c0_i32_0 : i32, i32
  }
  func.func @transform_11(%arg0: i32) -> (i32, i32) {
    %c0_i32 = arith.constant 0 : i32
    %c0_i32_0 = arith.constant 0 : i32
    %c0_i32_1 = arith.constant 0 : i32
    return %c0_i32, %c0_i32_0 : i32, i32
  }
  func.func @transform_12(%arg0: i32) -> (i32, i32) {
    %c0_i32 = arith.constant 0 : i32
    %c0_i32_0 = arith.constant 0 : i32
    %c0_i32_1 = arith.constant 0 : i32
    return %c0_i32, %c0_i32_0 : i32, i32
  }
  func.func @transform_13(%arg0: i32) -> (i32, i32) {
    %c0_i32 = arith.constant 0 : i32
    %c0_i32_0 = arith.constant 0 : i32
    %c0_i32_1 = arith.constant 0 : i32
    return %c0_i32, %c0_i32_0 : i32, i32
  }
  func.func @transform_14(%arg0: i32) -> (i32, i32) {
    %c0_i32 = arith.constant 0 : i32
    %c0_i32_0 = arith.constant 0 : i32
    %c0_i32_1 = arith.constant 0 : i32
    return %c0_i32, %c0_i32_0 : i32, i32
  }
  func.func @transform_15(%arg0: i32) -> (i32, i32) {
    %c0_i32 = arith.constant 0 : i32
    %c0_i32_0 = arith.constant 0 : i32
    %c0_i32_1 = arith.constant 0 : i32
    return %c0_i32, %c0_i32_0 : i32, i32
  }
  func.func @transform_16(%arg0: i32) -> (i32, i32) {
    %c0_i32 = arith.constant 0 : i32
    %c0_i32_0 = arith.constant 0 : i32
    %c0_i32_1 = arith.constant 0 : i32
    return %c0_i32, %c0_i32_0 : i32, i32
  }
  func.func @transform_17(%arg0: i32) -> (i32, i32) {
    %c0_i32 = arith.constant 0 : i32
    %c0_i32_0 = arith.constant 0 : i32
    return %arg0, %c0_i32 : i32, i32
  }
}

</mosaic_0001>

<bundles_post_ra>
// kernel: tpu_custom_call.1
= control target key start
LH: loop header
LB: loop body
LE: loop exit
PB: predicated region body
PF: predicated region fallthrough
CT: control target
= control target key end

     0   :  { %s2613_s0 = inlined_call_operand.hbm [shape: bf16[2,16,32], index: 0, kind: input, shape index: {}]   ;;  %s2614_s1 = inlined_call_operand.hbm [shape: bf16[32,128], index: 1, kind: input, shape index: {}]   ;;  %s2615_s2 = inlined_call_operand.vmem [shape: f32[1,128], index: 2, kind: input, shape index: {}]   ;;  %s2616_s3 = inlined_call_operand.hbm [shape: bf16[128,128], index: 3, kind: input, shape index: {}]   ;;  %s2617_s4 = inlined_call_operand.vmem [shape: f32[1,128], index: 4, kind: input, shape index: {}]   ;;  %s2618_s5 = inlined_call_operand.vmem [shape: bf16[32,128], index: 5, kind: input, shape index: {}]   ;;  %s2619_s6 = inlined_call_operand.hbm [shape: bf16[32,128], index: 6, kind: input, shape index: {}]   ;;  %s2620_s7 = inlined_call_operand.vmem [shape: f32[1,128], index: 7, kind: input, shape index: {}]   ;;  %s2621_s8 = inlined_call_operand.hbm [shape: bf16[128,128], index: 8, kind: input, shape index: {}]   ;;  %s2622_s9 = inlined_call_operand.vmem [shape: f32[1,128], index: 9, kind: input, shape index: {}]   ;;  %s2623_s10 = inlined_call_operand.hbm [shape: bf16[128,128], index: 10, kind: input, shape index: {}]   ;;  %s2624_s11 = inlined_call_operand.hbm [shape: bf16[128,128], index: 11, kind: input, shape index: {}]   ;;  %s2625_s12 = inlined_call_operand.vmem [shape: f32[1,128], index: 12, kind: input, shape index: {}]   ;;  %s2626_s13 = inlined_call_operand.hbm [shape: bf16[128,128], index: 13, kind: input, shape index: {}]   ;;  %s2627_s14 = inlined_call_operand.vmem [shape: f32[1,128], index: 14, kind: input, shape index: {}]   ;;  %s2628_s15 = inlined_call_operand.hbm [shape: bf16[128,128], index: 15, kind: input, shape index: {}]   ;;  %s2629_s16 = inlined_call_operand.vmem [shape: f32[1,128], index: 16, kind: input, shape index: {}]   ;;  %s2630_s17 = inlined_call_operand.hbm [shape: f32[2,128], index: 17, kind: output, shape index: {}]  }
   0x1   :  { %2634 = sst [smem:[#allocation24_spill]] %s2613_s0 }
   0x2   :  { %2635 = sst [smem:[#allocation25_spill]] %s2614_s1 }
   0x3   :  { %2636 = sst [smem:[#allocation26_spill]] %s2630_s17 }
   0x4   :  { %22 = vsyncpa [#allocation3], 0 }
   0x5   :  { %23 = vsyncpa [#allocation6], 0 }
   0x6   :  { %24 = vsyncpa [#allocation9], 0 }
   0x7   :  { %25 = vsyncpa [#allocation12], 0 }
   0x8   :  { %26 = vsyncpa [#allocation15], 0 }
   0x9   :  { %27 = vsyncpa [#allocation4], 0  ;;  %s2205_s24 = smov [#allocation5]   ;;  %s2206_s26 = smov [#allocation8]  }
   0xa   :  { %s45_s25 = sshll.u32 %s2205_s24, 4  ;;  %s75_s27 = sshll.u32 %s2206_s26, 4  ;;  %s46_s25 = int_to_ptr.vmem [resolvable:$true] %s45_s25  ;;  %s2309_s27 = int_to_ptr.vmem [resolvable:$true] %s75_s27 }
   0xb   :  { %s2637_s0 = sld [smem:[#allocation25_spill]] }
  0x11   :  { %s1973_s30 = scalar_lea.hbm %s2637_s0, 256 }
  0x12   :  { %p1974_p0 = scmp.ne.s32.totalorder %s2637_s0, %s1973_s30  ;;  %p1977_p1 = scmp.lt.u32.totalorder %s1973_s30, %s2637_s0 }
  0x14   :  { %p1979_p2 = pnand %p1977_p1, %p1974_p0 }
  0x16   :  { %1982 = shalt.err (!%p1979_p2)
}
  0x17   :  { %s1983_s21 = scalar_lea.vmem %s46_s25, 256  ;;  %p1988_p4 = scmp.lt.s32.totalorder %s46_s25, %s46_s25 }
  0x18   :  { %p1984_p3 = scmp.ne.s32.totalorder %s46_s25, %s1983_s21  ;;  %p1989_p5 = scmp.lt.s32.totalorder %s1983_s21, %s1983_s21 }
  0x1a   :  { %p1990_p6 = por %p1989_p5, %p1988_p4 }
  0x1c   :  { %p1991_p7 = pnand %p1990_p6, %p1984_p3 }
  0x1e   :  { %1994 = shalt.err (!%p1991_p7)
}
  0x1f   :  { %s2207_s22 = smov 64   ;;  %s2208_s23 = smov 4  }
  0x20   :  { %51 = dma.hbm_to_vmem [thread:$0]  %s2637_s0, 256, %s46_s25, [#allocation6], %s2207_s22, %s2207_s22, %s2208_s23  }
  0x21   :  { %s1995_s30 = scalar_lea.hbm %s2619_s6, 256 }
  0x22   :  { %p1996_p8 = scmp.ne.s32.totalorder %s2619_s6, %s1995_s30  ;;  %p1999_p9 = scmp.lt.u32.totalorder %s1995_s30, %s2619_s6 }
  0x24   :  { %p2001_p10 = pnand %p1999_p9, %p1996_p8 }
  0x26   :  { %2004 = shalt.err (!%p2001_p10)
}
  0x27   :  { %s2005_s21 = scalar_lea.vmem %s2309_s27, 256  ;;  %p2010_p12 = scmp.lt.s32.totalorder %s2309_s27, %s2309_s27 }
  0x28   :  { %p2006_p11 = scmp.ne.s32.totalorder %s2309_s27, %s2005_s21  ;;  %p2011_p13 = scmp.lt.s32.totalorder %s2005_s21, %s2005_s21 }
  0x2a   :  { %p2012_p0 = por %p2011_p13, %p2010_p12 }
  0x2c   :  { %p2013_p1 = pnand %p2012_p0, %p2006_p11 }
  0x2e   :  { %2016 = shalt.err (!%p2013_p1)
}
  0x2f   :  { %81 = dma.hbm_to_vmem [thread:$0]  %s2619_s6, 256, %s2309_s27, [#allocation9], %s2207_s22, %s2207_s22, %s2208_s23  }
  0x30   :  { %s2209_s24 = smov [#allocation11]   ;;  %s2210_s28 = smov [#allocation14]  }
  0x31   :  { %s103_s26 = sshll.u32 %s2209_s24, 4  ;;  %s129_s29 = sshll.u32 %s2210_s28, 4  ;;  %s104_s26 = int_to_ptr.vmem [resolvable:$true] %s103_s26  ;;  %s2346_s29 = int_to_ptr.vmem [resolvable:$true] %s129_s29 }
  0x32   :  { %s2017_s19 = scalar_lea.hbm %s2623_s10, 1024 }
  0x33   :  { %p2018_p2 = scmp.ne.s32.totalorder %s2623_s10, %s2017_s19  ;;  %p2021_p3 = scmp.lt.u32.totalorder %s2017_s19, %s2623_s10 }
  0x35   :  { %p2023_p4 = pnand %p2021_p3, %p2018_p2 }
  0x37   :  { %2026 = shalt.err (!%p2023_p4)
}
  0x38   :  { %s2027_s6 = scalar_lea.vmem %s104_s26, 1024  ;;  %p2032_p6 = scmp.lt.s32.totalorder %s104_s26, %s104_s26 }
  0x39   :  { %p2028_p5 = scmp.ne.s32.totalorder %s104_s26, %s2027_s6  ;;  %p2033_p7 = scmp.lt.s32.totalorder %s2027_s6, %s2027_s6 }
  0x3b   :  { %p2034_p8 = por %p2033_p7, %p2032_p6 }
  0x3d   :  { %p2035_p9 = pnand %p2034_p8, %p2028_p5 }
  0x3f   :  { %2038 = shalt.err (!%p2035_p9)
}
  0x40   :  { %109 = dma.hbm_to_vmem [thread:$0]  %s2623_s10, 1024, %s104_s26, [#allocation12], %s2207_s22, %s2207_s22, %s2208_s23  }
  0x41   :  { %s2039_s17 = scalar_lea.hbm %s2626_s13, 1024 }
  0x42   :  { %p2040_p10 = scmp.ne.s32.totalorder %s2626_s13, %s2039_s17  ;;  %p2043_p11 = scmp.lt.u32.totalorder %s2039_s17, %s2626_s13 }
  0x44   :  { %p2045_p12 = pnand %p2043_p11, %p2040_p10 }
  0x46   :  { %2048 = shalt.err (!%p2045_p12)
}
  0x47   :  { %s2049_s1 = scalar_lea.vmem %s2346_s29, 1024  ;;  %p2054_p0 = scmp.lt.s32.totalorder %s2346_s29, %s2346_s29 }
  0x48   :  { %p2050_p13 = scmp.ne.s32.totalorder %s2346_s29, %s2049_s1  ;;  %p2055_p1 = scmp.lt.s32.totalorder %s2049_s1, %s2049_s1 }
  0x4a   :  { %p2056_p2 = por %p2055_p1, %p2054_p0 }
  0x4c   :  { %p2057_p3 = pnand %p2056_p2, %p2050_p13 }
  0x4e   :  { %2060 = shalt.err (!%p2057_p3)
}
  0x4f   :  { %135 = dma.hbm_to_vmem [thread:$0]  %s2626_s13, 1024, %s2346_s29, [#allocation15], %s2207_s22, %s2207_s22, %s2208_s23  }
  0x50   :  { %s2211_s20 = smov [#allocation2]   ;;  %s2212_s6 = smov [#allocation7]  }
  0x51   :  { %s33_s21 = sshll.u32 %s2211_s20, 4  ;;  %s59_s27 = sshll.u32 %s2212_s6, 4  ;;  %s34_s21 = int_to_ptr.vmem [resolvable:$true] %s33_s21  ;;  %s2383_s27 = int_to_ptr.vmem [resolvable:$true] %s59_s27 }
  0x52   :  { %s2638_s24 = sld [smem:[#allocation24_spill]] }
  0x58   :  { %s2061_s17 = scalar_lea.hbm %s2638_s24, 256 }
  0x59   :  { %p2062_p4 = scmp.ne.s32.totalorder %s2638_s24, %s2061_s17  ;;  %p2065_p5 = scmp.lt.u32.totalorder %s2061_s17, %s2638_s24 }
  0x5b   :  { %p2067_p6 = pnand %p2065_p5, %p2062_p4 }
  0x5d   :  { %2070 = shalt.err (!%p2067_p6)
}
  0x5e   :  { %s2071_s13 = scalar_lea.vmem %s34_s21, 256  ;;  %p2076_p8 = scmp.lt.s32.totalorder %s34_s21, %s34_s21 }
  0x5f   :  { %p2072_p7 = scmp.ne.s32.totalorder %s34_s21, %s2071_s13  ;;  %p2077_p9 = scmp.lt.s32.totalorder %s2071_s13, %s2071_s13 }
  0x61   :  { %p2078_p10 = por %p2077_p9, %p2076_p8 }
  0x63   :  { %p2079_p11 = pnand %p2078_p10, %p2072_p7 }
  0x65   :  { %2082 = shalt.err (!%p2079_p11)
}
  0x66   :  { %39 = dma.hbm_to_vmem [thread:$0]  %s2638_s24, 256, %s34_s21, [#allocation3], %s2207_s22, %s2207_s22, %s2208_s23  }
  0x67   :  { %s2083_s20 = scalar_lea.hbm %s2616_s3, 1024 }
  0x68   :  { %p2084_p12 = scmp.ne.s32.totalorder %s2616_s3, %s2083_s20  ;;  %p2087_p13 = scmp.lt.u32.totalorder %s2083_s20, %s2616_s3 }
  0x6a   :  { %p2089_p0 = pnand %p2087_p13, %p2084_p12 }
  0x6c   :  { %2092 = shalt.err (!%p2089_p0)
}
  0x6d   :  { %s2093_s28 = scalar_lea.vmem %s2383_s27, 1024  ;;  %p2098_p2 = scmp.lt.s32.totalorder %s2383_s27, %s2383_s27 }
  0x6e   :  { %p2094_p1 = scmp.ne.s32.totalorder %s2383_s27, %s2093_s28  ;;  %p2099_p3 = scmp.lt.s32.totalorder %s2093_s28, %s2093_s28 }
  0x70   :  { %p2100_p4 = por %p2099_p3, %p2098_p2 }
  0x72   :  { %p2101_p5 = pnand %p2100_p4, %p2094_p1 }
  0x74   :  { %2104 = shalt.err (!%p2101_p5)
}
  0x75   :  { %65 = dma.hbm_to_vmem [thread:$0]  %s2616_s3, 1024, %s2383_s27, [#allocation6], %s2207_s22, %s2207_s22, %s2208_s23  }
  0x76   :  { %s2213_s30 = smov [#allocation10]   ;;  %s2214_s19 = smov [#allocation13]  }
  0x77   :  { %s89_s18 = sshll.u32 %s2213_s30, 4  ;;  %s115_s13 = sshll.u32 %s2214_s19, 4  ;;  %s90_s18 = int_to_ptr.vmem [resolvable:$true] %s89_s18  ;;  %s2420_s13 = int_to_ptr.vmem [resolvable:$true] %s115_s13 }
  0x78   :  { %s2105_s10 = scalar_lea.hbm %s2621_s8, 1024 }
  0x79   :  { %p2106_p6 = scmp.ne.s32.totalorder %s2621_s8, %s2105_s10  ;;  %p2109_p7 = scmp.lt.u32.totalorder %s2105_s10, %s2621_s8 }
  0x7b   :  { %p2111_p8 = pnand %p2109_p7, %p2106_p6 }
  0x7d   :  { %2114 = shalt.err (!%p2111_p8)
}
  0x7e   :  { %s2115_s3 = scalar_lea.vmem %s90_s18, 1024  ;;  %p2120_p10 = scmp.lt.s32.totalorder %s90_s18, %s90_s18 }
  0x7f   :  { %p2116_p9 = scmp.ne.s32.totalorder %s90_s18, %s2115_s3  ;;  %p2121_p11 = scmp.lt.s32.totalorder %s2115_s3, %s2115_s3 }
  0x81   :  { %p2122_p12 = por %p2121_p11, %p2120_p10 }
  0x83   :  { %p2123_p13 = pnand %p2122_p12, %p2116_p9 }
  0x85   :  { %2126 = shalt.err (!%p2123_p13)
}
  0x86   :  { %95 = dma.hbm_to_vmem [thread:$0]  %s2621_s8, 1024, %s90_s18, [#allocation9], %s2207_s22, %s2207_s22, %s2208_s23  }
  0x87   :  { %s2127_s21 = scalar_lea.hbm %s2624_s11, 1024 }
  0x88   :  { %p2128_p0 = scmp.ne.s32.totalorder %s2624_s11, %s2127_s21  ;;  %p2131_p1 = scmp.lt.u32.totalorder %s2127_s21, %s2624_s11 }
  0x8a   :  { %p2133_p2 = pnand %p2131_p1, %p2128_p0 }
  0x8c   :  { %2136 = shalt.err (!%p2133_p2)
}
  0x8d   :  { %s2137_s1 = scalar_lea.vmem %s2420_s13, 1024  ;;  %p2142_p4 = scmp.lt.s32.totalorder %s2420_s13, %s2420_s13 }
  0x8e   :  { %p2138_p3 = scmp.ne.s32.totalorder %s2420_s13, %s2137_s1  ;;  %p2143_p5 = scmp.lt.s32.totalorder %s2137_s1, %s2137_s1 }
  0x90   :  { %p2144_p6 = por %p2143_p5, %p2142_p4 }
  0x92   :  { %p2145_p7 = pnand %p2144_p6, %p2138_p3 }
  0x94   :  { %2148 = shalt.err (!%p2145_p7)
}
  0x95   :  { %121 = dma.hbm_to_vmem [thread:$0]  %s2624_s11, 1024, %s2420_s13, [#allocation12], %s2207_s22, %s2207_s22, %s2208_s23  }
  0x96   :  { %s2215_s10 = smov [#allocation16]   ;;  %s2149_s25 = scalar_lea.hbm %s2628_s15, 1024 }
  0x97   :  { %s143_s26 = sshll.u32 %s2215_s10, 4  ;;  %p2150_p8 = scmp.ne.s32.totalorder %s2628_s15, %s2149_s25  ;;  %s144_s26 = int_to_ptr.vmem [resolvable:$true] %s143_s26 }
  0x98   :  { %p2153_p9 = scmp.lt.u32.totalorder %s2149_s25, %s2628_s15 }
  0x9a   :  { %p2155_p10 = pnand %p2153_p9, %p2150_p8 }
  0x9c   :  { %2158 = shalt.err (!%p2155_p10)
}
  0x9d   :  { %s2159_s28 = scalar_lea.vmem %s144_s26, 1024  ;;  %p2164_p12 = scmp.lt.s32.totalorder %s144_s26, %s144_s26 }
  0x9e   :  { %p2160_p11 = scmp.ne.s32.totalorder %s144_s26, %s2159_s28  ;;  %p2165_p13 = scmp.lt.s32.totalorder %s2159_s28, %s2159_s28 }
  0xa0   :  { %p2166_p0 = por %p2165_p13, %p2164_p12 }
  0xa2   :  { %p2167_p1 = pnand %p2166_p0, %p2160_p11 }
  0xa4   :  { %2170 = shalt.err (!%p2167_p1)
}
  0xa5   :  { %149 = dma.hbm_to_vmem [thread:$0]  %s2628_s15, 1024, %s144_s26, [#allocation15], %s2207_s22, %s2207_s22, %s2208_s23  }
  0xa6   :  { %2193 = dma.done.wait [#allocation3], 256  }
  0xa7   :  { %2194 = vsyncadd [#allocation3], 4294967040 }
  0xa8   :  { %2195 = dma.done.wait [#allocation6], 1280  }
  0xa9   :  { %2196 = vsyncadd [#allocation6], 4294966016 }
  0xaa   :  { %2197 = dma.done.wait [#allocation9], 1280  }
  0xab   :  { %2198 = vsyncadd [#allocation9], 4294966016 }
  0xac   :  { %2199 = dma.done.wait [#allocation12], 2048  }
  0xad   :  { %2200 = vsyncadd [#allocation12], 4294965248 }
  0xae   :  { %2201 = dma.done.wait [#allocation15], 2048  }
  0xaf   :  { %2202 = vsyncadd [#allocation15], 4294965248  ;;  %v1905_v0 = vld [vmem:[#allocation5] sm:$0xff]   ;;  %v1906_v1 = vld [vmem:[#allocation5 + $0x8] sm:$0xff]   ;;  %vm217_vm0 = vcmask 261120   ;;  %v2216_v31 = vmov 0.0  }
  0xb0   :  { %1706 = vmatprep.subr.bf16.mxu1 %v1905_v0  ;;  %v2472_v2 = vld [vmem:[#allocation2] sm:$0xf]  ;;  %v2474_v3 = vld [vmem:[#allocation2 + $0x4] sm:$0xf]  ;;  %v2476_v4 = vld [vmem:[#allocation2 + $0x8] sm:$0xf]  ;;  %1734 = vmatprep.subr.bf16.mxu0 %v2216_v31 }
  0xb1   :  { %1707 = vmatpush3.bf16.msra.mxu1 %v1905_v0  ;;  %v2480_v5 = vcombine.low %v2472_v2, %v2474_v3  ;;  %v2482_v6 = vld [vmem:[#allocation2 + $0xc] sm:$0xf]  ;;  %v1909_v7 = vld [vmem:[#allocation7] sm:$0xff]   ;;  %v1911_v10 = vld [vmem:[#allocation7 + $0x10] sm:$0xff]   ;;  %vm2217_vm1 = vmmov 0   ;;  %vm487_vm2 = vcmask 64512  }
  0xb2   :  { %1708 = vmatprep.subr.bf16.mxu1 %v1906_v1  ;;  %v2488_v8 = vcombine.low %v2476_v4, %v2482_v6  ;;  %v1910_v9 = vld [vmem:[#allocation7 + $0x8] sm:$0xff]   ;;  %v1912_v11 = vld [vmem:[#allocation7 + $0x18] sm:$0xff]   ;;  %v1913_v12 = vld [vmem:[#allocation7 + $0x20] sm:$0xff]   ;;  %1736 = vmatprep.mubr.msk.bf16.mxu0 %vm2217_vm1, %v2216_v31  ;;  %vm545_vm3 = vcmask 1043456   ;;  %vm1112_vm4 = vcmask 1041409   ;;  %s2218_s26 = smov [#allocation17]  }
  0xb3   :  { %1710 = vmatprep.mubr.msk.bf16.mxu1 %vm217_vm0, %v2480_v5  ;;  %v1914_v13 = vld [vmem:[#allocation7 + $0x28] sm:$0xff]   ;;  %v1915_v14 = vld [vmem:[#allocation7 + $0x30] sm:$0xff]   ;;  %v1916_v15 = vld [vmem:[#allocation7 + $0x38] sm:$0xff]   ;;  %s1540_s20 = sshll.u32 %s2218_s26, 4  ;;  %s1541_s20 = int_to_ptr.vmem [resolvable:$true] %s1540_s20 }
  0xb4   :  { %v1553_v16 = vld [vmem:[%s2615_s2] ss:$0 sm:$0xff]  ;;  %p2176_p3 = scmp.lt.s32.totalorder %s1541_s20, %s1541_s20 }
  0xb5   :  { %1709 = vmatpush3.bf16.msra.mxu1 %v1906_v1  ;;  %v1560_v35 = vld [vmem:[%s2617_s4] ss:$0 sm:$0xff] }
  0xb6   :  { %1714 = vmatprep.subr.bf16.mxu1 %v1909_v7 }
  0xb8   :  { %1711 = vmatmul.mubr.msk.bf16.vlgmr.msra.gmra.mrb[0].mxu1 %vm217_vm0, %v2488_v8 }
  0xb9   :  { %1715 = vmatpush3.bf16.msra.mxu1 %v1909_v7 }
  0xba   :  { %1716 = vmatprep.subr.bf16.mxu1 %v1910_v9 }
  0xbd   :  { %1717 = vmatpush3.bf16.msra.mxu1 %v1910_v9 }
  0xbe   :  { %1718 = vmatprep.subr.bf16.mxu1 %v1911_v10 }
  0xc1   :  { %1719 = vmatpush3.bf16.msra.mxu1 %v1911_v10 }
  0xc2   :  { %1720 = vmatprep.subr.bf16.mxu1 %v1912_v11 }
  0xc5   :  { %1721 = vmatpush3.bf16.msra.mxu1 %v1912_v11 }
  0xc6   :  { %1722 = vmatprep.subr.bf16.mxu1 %v1913_v12 }
  0xc9   :  { %1723 = vmatpush3.bf16.msra.mxu1 %v1913_v12 }
  0xca   :  { %1724 = vmatprep.subr.bf16.mxu1 %v1914_v13 }
  0xcd   :  { %1725 = vmatpush3.bf16.msra.mxu1 %v1914_v13 }
  0xce   :  { %1726 = vmatprep.subr.bf16.mxu1 %v1915_v14 }
  0xd1   :  { %1727 = vmatpush3.bf16.msra.mxu1 %v1915_v14 }
  0xd2   :  { %1728 = vmatprep.subr.bf16.mxu1 %v1916_v15 }
  0xd5   :  { %1729 = vmatpush3.bf16.msra.mxu1 %v1916_v15 }
  0xd6   :  { %1758 = vmatprep.subr.bf16.mxu1 %v2216_v31 }
 0x18b   :  { %v1712_v17 = vpop.f32.mrb[0].mxu1 }
 0x18c   :  { %v267_v18 = vadd.f32 %v1712_v17, %v1553_v16  ;;  %v258_v19 = vpop.f32.mrb[1].mxu1 }
 0x18d   :  { %v259_v20 = vadd.f32 %v1553_v16, %v258_v19  ;;  %v1713_v21 = vpop.f32.mrb[2].mxu1 }
 0x18e   :  { %v270_v22 = vadd.f32 %v1713_v21, %v1553_v16  ;;  %v261_v23 = vpop.f32.mrb[3].mxu1  ;;  %v275_v25 = vmax.f32 %v267_v18, 0.0 }
 0x18f   :  { %v262_v24 = vadd.f32 %v1553_v16, %v261_v23  ;;  %v273_v27 = vmax.f32 %v259_v20, 0.0 }
 0x190   :  { %v276_v26 = vmax.f32 %v270_v22, 0.0 }
 0x191   :  { %v274_v28 = vmax.f32 %v262_v24, 0.0 }
 0x192   :  { %v278_v29 = vpack.c.bf16 %v276_v26, %v275_v25 }
 0x193   :  { %v277_v30 = vpack.c.bf16 %v274_v28, %v273_v27 }
 0x195   :  { %1730 = vmatprep.mubr.bf16.mxu1 %v277_v30 }
 0x196   :  { %1731 = vmatmul.mubr.bf16.vlgmr.msra.gmra.mrb[4].mxu1 %v278_v29 }
 0x197   :  { %1760 = vmatprep.mubr.msk.bf16.mxu1 %vm2217_vm1, %v2216_v31 }
 0x269   :  { %v1732_v32 = vpop.f32.mrb[4].mxu1 }
 0x26a   :  { %v384_v33 = vpop.f32.mrb[5].mxu1  ;;  %v393_v44 = vadd.f32 %v1732_v32, %v1560_v35 }
 0x26b   :  { %v1733_v34 = vpop.f32.mrb[6].mxu1  ;;  %v385_v39 = vadd.f32 %v1560_v35, %v384_v33 }
 0x26c   :  { %v387_v36 = vpop.f32.mrb[7].mxu1  ;;  %v396_v40 = vadd.f32 %v1733_v34, %v1560_v35  ;;  %v401_v47 = vmax.f32 %v393_v44, 0.0 }
 0x26d   :  { %v388_v37 = vadd.f32 %v1560_v35, %v387_v36  ;;  %v399_v42 = vmax.f32 %v385_v39, 0.0  ;;  %v655_v36 = vsel %vm545_vm3, %v2472_v2, 0 }
 0x26e   :  { %v402_v43 = vmax.f32 %v396_v40, 0.0  ;;  %v404_v48 = vpack.c.bf16 %v401_v47, %v401_v47  ;;  %1759 = vmatpush3.bf16.msra.mxu1 %v655_v36 }
 0x26f   :  { %v400_v38 = vmax.f32 %v388_v37, 0.0  ;;  %v403_v45 = vpack.c.bf16 %v399_v42, %v399_v42 }
 0x270   :  { %v406_v46 = vpack.c.bf16 %v402_v43, %v402_v43 }
 0x271   :  { %v405_v41 = vpack.c.bf16 %v400_v38, %v400_v38  ;;  %v547_v38 = vsel %vm545_vm3, %v2474_v3, 0 }
 0x273   :  { %1735 = vmatpush3.bf16.xpose.msra.mxu0 %v405_v41 }
 0x274   :  { %1740 = vmatprep.subr.bf16.mxu0 %v2216_v31 }
 0x27a   :  { %1737 = vmatmul.mubr.bf16.vlgmr.msra.gmra.mrb[0].mxu0 %v403_v45 }
 0x27b   :  { %1741 = vmatpush3.bf16.xpose.msra.mxu0 %v406_v46  ;;  %1742 = vmatprep.mubr.msk.bf16.mxu0 %vm2217_vm1, %v2216_v31 }
 0x27c   :  { %1746 = vmatprep.subr.bf16.mxu0 %v2216_v31 }
 0x282   :  { %1743 = vmatmul.mubr.bf16.vlgmr.msra.gmra.mrb[4].mxu0 %v404_v48  ;;  %v593_v48 = vsel %vm545_vm3, %v2482_v6, 0 }
 0x283   :  { %1748 = vmatprep.mubr.msk.bf16.mxu0 %vm2217_vm1, %v2216_v31  ;;  %1747 = vmatpush3.bf16.msra.mxu0 %v547_v38 }
 0x284   :  { %1752 = vmatprep.subr.bf16.mxu0 %v2216_v31 }
 0x34d   :  { %v441_v49 = vpop.f32.mrb[0].mxu0 }
 0x34e   :  { %v1738_v50 = vpop.f32.mrb[1].mxu0  ;;  %v488_v51 = vsel %vm487_vm2, %v441_v49, -inf }
 0x34f   :  { %489 = vmax.xlane.f32.xlu0 %v488_v51  ;;  %v444_v52 = vpop.f32.mrb[2].mxu0 }
 0x350   :  { %v1739_v53 = vpop.f32.mrb[3].mxu0  ;;  %v717_v52 = vsel %vm545_vm3, %v2476_v4, 0  ;;  %v1921_v4 = vld [vmem:[#allocation10] sm:$0xff]  }
 0x351   :  { %v1917_v53 = vld [vmem:[#allocation8] sm:$0xff]  }
 0x352   :  { %1770 = vmatprep.subr.bf16.mxu1 %v1917_v53 }
 0x355   :  { %v481_v54 = vpop.f32.mrb[4].mxu0 }
 0x356   :  { %v1744_v55 = vpop.f32.mrb[5].mxu0  ;;  %v491_v56 = vsel %vm487_vm2, %v481_v54, -inf }
 0x357   :  { %492 = vmax.xlane.f32.xlu0 %v491_v56  ;;  %v484_v57 = vpop.f32.mrb[6].mxu0  ;;  %v1919_v55 = vld [vmem:[%s2618_s5] sm:$0xff]   ;;  %v1922_v56 = vld [vmem:[#allocation10 + $0x8] sm:$0xff]  }
 0x358   :  { %v1745_v58 = vpop.f32.mrb[7].mxu0  ;;  %v1923_v57 = vld [vmem:[#allocation10 + $0x10] sm:$0xff]  }
 0x359   :  { %v1924_v58 = vld [vmem:[#allocation10 + $0x18] sm:$0xff]  }
 0x3dc   :  { %v490_v59 = vpop.xlane.xlu0 %489 }
 0x3dd   :  { %v494_v60 = vrot.slane %v490_v59, 4 }
 0x3df   :  { %v495_v61 = vmax.f32 %v490_v59, %v494_v60  ;;  %v1925_v59 = vld [vmem:[#allocation10 + $0x20] sm:$0xff]   ;;  %v1926_v60 = vld [vmem:[#allocation10 + $0x28] sm:$0xff]  }
 0x3e1   :  { %v496_v62 = vrot.slane %v495_v61, 2 }
 0x3e3   :  { %v497_v63 = vmax.f32 %v495_v61, %v496_v62 }
 0x3e4   :  { %v493_v0 = vpop.xlane.xlu0 %492 }
 0x3e5   :  { %v498_v1 = vrot.slane %v497_v63, 1  ;;  %v500_v7 = vrot.slane %v493_v0, 4 }
 0x3e7   :  { %v499_v9 = vmax.f32 %v497_v63, %v498_v1  ;;  %v501_v10 = vmax.f32 %v493_v0, %v500_v7 }
 0x3e9   :  { %v506_v11 = vsub.f32 %v441_v49, %v499_v9  ;;  %v502_v12 = vrot.slane %v501_v10, 2 }
 0x3eb   :  { %v508_v13 = vmul.f32 1.442695, %v506_v11  ;;  %v503_v14 = vmax.f32 %v501_v10, %v502_v12 }
 0x3ed   :  { %1961 = vpow2.f32 %v508_v13  ;;  %v504_v15 = vrot.slane %v503_v14, 1 }
 0x3ef   :  { %v505_v16 = vmax.f32 %v503_v14, %v504_v15 }
 0x3f1   :  { %v507_v17 = vsub.f32 %v481_v54, %v505_v16  ;;  %v1918_v54 = vld [vmem:[#allocation8 + $0x8] sm:$0xff]  }
 0x3f3   :  { %v510_v18 = vmul.f32 1.442695, %v507_v17 }
 0x3f5   :  { %1963 = vpow2.f32 %v510_v18 }
 0x3f7   :  { %v1962_v19 = vpop.eup %1961 }
 0x3f8   :  { %v512_v20 = vsel %vm487_vm2, %v1962_v19, 0.0 }
 0x3f9   :  { %513 = vadd.xlane.f32.xlu1 %v512_v20  ;;  %v524_v21 = vrot.slane %v512_v20, 4 }
 0x3fb   :  { %v525_v22 = vadd.f32 %v524_v21, %v512_v20 }
 0x3fd   :  { %v526_v23 = vrot.slane %v525_v22, 2 }
 0x3ff   :  { %v1964_v24 = vpop.eup %1963  ;;  %v527_v25 = vadd.f32 %v526_v23, %v525_v22 }
 0x400   :  { %v515_v26 = vsel %vm487_vm2, %v1964_v24, 0.0 }
 0x401   :  { %v528_v27 = vrot.slane %v527_v25, 1  ;;  %516 = vadd.xlane.f32.xlu1 %v515_v26  ;;  %v530_v29 = vrot.slane %v515_v26, 4 }
 0x403   :  { %v529_v28 = vadd.f32 %v528_v27, %v527_v25  ;;  %v531_v30 = vadd.f32 %v530_v29, %v515_v26  ;;  %v1920_v26 = vld [vmem:[%s2618_s5 + $0x8] sm:$0xff]  }
 0x404   :  { %v1928_v29 = vld [vmem:[#allocation10 + $0x38] sm:$0xff]  }
 0x405   :  { %1965 = vrcp.f32 %v529_v28  ;;  %v532_v32 = vrot.slane %v531_v30, 2  ;;  %v1927_v28 = vld [vmem:[#allocation10 + $0x30] sm:$0xff]  }
 0x407   :  { %v533_v34 = vadd.f32 %v532_v32, %v531_v30  ;;  %v1930_v30 = vld [vmem:[#allocation13] sm:$0xff]  }
 0x409   :  { %v534_v39 = vrot.slane %v533_v34, 1 }
 0x40b   :  { %v535_v40 = vadd.f32 %v534_v39, %v533_v34 }
 0x40d   :  { %1967 = vrcp.f32 %v535_v40 }
 0x40f   :  { %v1966_v33 = vpop.eup %1965 }
 0x410   :  { %v538_v35 = vmul.f32 %v1966_v33, %v1962_v19 }
 0x412   :  { %v540_v37 = vpack.c.bf16 %v538_v35, %v538_v35 }
 0x414   :  { %635 = vxpose.xlu0.c.b16.start.end [1/1] (short) (narrow) %v540_v37, 16 }
 0x417   :  { %v1968_v41 = vpop.eup %1967 }
 0x418   :  { %v539_v42 = vmul.f32 %v1968_v41, %v1964_v24 }
 0x41a   :  { %v541_v43 = vpack.c.bf16 %v539_v42, %v539_v42 }
 0x42e   :  { %697 = vxpose.xlu1.c.b16.start.end [1/1] (short) (narrow) %v541_v43, 16 }
 0x47a   :  { %v643_v44 = vpop.trf.xlu0 }
 0x47b   :  { %1761 = vmatmul.mubr.msk.bf16.vlgmr.msra.gmra.mrb[8].mxu1 %vm487_vm2, %v643_v44 }
 0x47c   :  { %1771 = vmatpush3.bf16.msra.mxu1 %v1917_v53  ;;  %v1941_v53 = vld [vmem:[#allocation11 + $0x30] sm:$0xff]  }
 0x47d   :  { %1772 = vmatprep.subr.bf16.mxu1 %v1918_v54 }
 0x480   :  { %1773 = vmatpush3.bf16.msra.mxu1 %v1918_v54  ;;  %v1942_v54 = vld [vmem:[#allocation13 + $0x30] sm:$0xff]  }
 0x481   :  { %1778 = vmatprep.subr.bf16.mxu1 %v1919_v55 }
 0x486   :  { %v514_v2 = vpop.xlane.xlu1 %513 }
 0x487   :  { %1969 = vrcp.f32 %v514_v2  ;;  %v1929_v2 = vld [vmem:[#allocation11] sm:$0xff]  }
 0x48e   :  { %v517_v45 = vpop.xlane.xlu1 %516 }
 0x48f   :  { %1971 = vrcp.f32 %v517_v45  ;;  %v1931_v45 = vld [vmem:[#allocation11 + $0x8] sm:$0xff]  }
 0x491   :  { %v1970_v46 = vpop.eup %1969 }
 0x492   :  { %v520_v3 = vmul.f32 %v1970_v46, %v1962_v19  ;;  %v1932_v46 = vld [vmem:[#allocation13 + $0x8] sm:$0xff]  }
 0x494   :  { %v522_v47 = vpack.c.bf16 %v520_v3, %v520_v3  ;;  %v705_v6 = vpop.trf.xlu1  ;;  %v1933_v3 = vld [vmem:[#allocation11 + $0x10] sm:$0xff]  }
 0x496   :  { %1749 = vmatmul.mubr.msk.bf16.vlgmr.msra.gmra.mrb[8].mxu0 %vm487_vm2, %v522_v47  ;;  %v1934_v47 = vld [vmem:[#allocation13 + $0x10] sm:$0xff]  }
 0x497   :  { %1753 = vmatpush3.bf16.msra.mxu0 %v593_v48  ;;  %1754 = vmatprep.mubr.msk.bf16.mxu0 %vm2217_vm1, %v2216_v31  ;;  %v1935_v48 = vld [vmem:[#allocation11 + $0x18] sm:$0xff]  }
 0x498   :  { %1764 = vmatprep.subr.bf16.mxu0 %v2216_v31 }
 0x499   :  { %v1972_v49 = vpop.eup %1971 }
 0x49a   :  { %v521_v50 = vmul.f32 %v1972_v49, %v1964_v24  ;;  %v1936_v49 = vld [vmem:[#allocation13 + $0x18] sm:$0xff]  }
 0x49c   :  { %v523_v51 = vpack.c.bf16 %v521_v50, %v521_v50  ;;  %v1937_v50 = vld [vmem:[#allocation11 + $0x20] sm:$0xff]  }
 0x49e   :  { %1755 = vmatmul.mubr.msk.bf16.vlgmr.msra.gmra.mrb[12].mxu0 %vm487_vm2, %v523_v51  ;;  %v1938_v51 = vld [vmem:[#allocation13 + $0x20] sm:$0xff]  }
 0x49f   :  { %1765 = vmatpush3.bf16.msra.mxu0 %v717_v52  ;;  %1766 = vmatprep.mubr.msk.bf16.mxu0 %vm2217_vm1, %v2216_v31  ;;  %v1939_v52 = vld [vmem:[#allocation11 + $0x28] sm:$0xff]  }
 0x4a0   :  { %1786 = vmatprep.subr.bf16.mxu0 %v1921_v4 }
 0x4a6   :  { %1767 = vmatmul.mubr.msk.bf16.vlgmr.msra.gmra.mrb[16].mxu0 %vm487_vm2, %v705_v6  ;;  %v1940_v6 = vld [vmem:[#allocation13 + $0x28] sm:$0xff]  }
 0x4a7   :  { %1787 = vmatpush3.bf16.msra.mxu0 %v1921_v4  ;;  %v1944_v4 = vld [vmem:[#allocation13 + $0x38] sm:$0xff]  }
 0x4a8   :  { %1788 = vmatprep.subr.bf16.mxu0 %v1922_v56 }
 0x4ab   :  { %1789 = vmatpush3.bf16.msra.mxu0 %v1922_v56  ;;  %v1582_v56 = vld [vmem:[%s2622_s9] ss:$0 sm:$0xff] }
 0x4ac   :  { %1790 = vmatprep.subr.bf16.mxu0 %v1923_v57 }
 0x4af   :  { %1791 = vmatpush3.bf16.msra.mxu0 %v1923_v57 }
 0x4b0   :  { %1792 = vmatprep.subr.bf16.mxu0 %v1924_v58 }
 0x4b3   :  { %1793 = vmatpush3.bf16.msra.mxu0 %v1924_v58 }
 0x4b4   :  { %1794 = vmatprep.subr.bf16.mxu0 %v1925_v59 }
 0x4b7   :  { %1795 = vmatpush3.bf16.msra.mxu0 %v1925_v59 }
 0x4b8   :  { %1796 = vmatprep.subr.bf16.mxu0 %v1926_v60 }
 0x4bb   :  { %1797 = vmatpush3.bf16.msra.mxu0 %v1926_v60 }
 0x4bc   :  { %1798 = vmatprep.subr.bf16.mxu0 %v1927_v28 }
 0x4bf   :  { %1799 = vmatpush3.bf16.msra.mxu0 %v1927_v28 }
 0x4c0   :  { %1800 = vmatprep.subr.bf16.mxu0 %v1928_v29 }
 0x4c3   :  { %1801 = vmatpush3.bf16.msra.mxu0 %v1928_v29 }
 0x4c4   :  { %1826 = vmatprep.subr.bf16.mxu0 %v2216_v31 }
 0x54e   :  { %v691_v61 = vpop.f32.mrb[8].mxu1 }
 0x54f   :  { %v1762_v62 = vpop.f32.mrb[9].mxu1  ;;  %v761_v1 = vpack.c.bf16 %v691_v61, %v691_v61 }
 0x550   :  { %v694_v63 = vpop.f32.mrb[10].mxu1 }
 0x551   :  { %v1763_v0 = vpop.f32.mrb[11].mxu1  ;;  %v765_v7 = vrot.slane %v761_v1, 4 }
 0x569   :  { %v583_v9 = vpop.f32.mrb[8].mxu0 }
 0x56a   :  { %v759_v10 = vpack.c.bf16 %v583_v9, %v583_v9  ;;  %v1750_v11 = vpop.f32.mrb[9].mxu0 }
 0x56b   :  { %v586_v12 = vpop.f32.mrb[10].mxu0 }
 0x56c   :  { %v1751_v13 = vpop.f32.mrb[11].mxu0  ;;  %v769_v14 = vsel %vm545_vm3, %v759_v10, %v765_v7 }
 0x56d   :  { %1774 = vmatprep.mubr.msk.bf16.mxu1 %vm217_vm0, %v769_v14 }
 0x571   :  { %v629_v15 = vpop.f32.mrb[12].mxu0 }
 0x572   :  { %v1756_v16 = vpop.f32.mrb[13].mxu0  ;;  %v760_v23 = vpack.c.bf16 %v629_v15, %v629_v15 }
 0x573   :  { %v632_v17 = vpop.f32.mrb[14].mxu0 }
 0x574   :  { %v1757_v18 = vpop.f32.mrb[15].mxu0 }
 0x579   :  { %v753_v19 = vpop.f32.mrb[16].mxu0 }
 0x57a   :  { %v762_v20 = vpack.c.bf16 %v753_v19, %v753_v19  ;;  %v1768_v21 = vpop.f32.mrb[17].mxu0 }
 0x57b   :  { %v756_v22 = vpop.f32.mrb[18].mxu0 }
 0x57c   :  { %v766_v24 = vrot.slane %v762_v20, 4  ;;  %v1769_v25 = vpop.f32.mrb[19].mxu0 }
 0x57e   :  { %v772_v27 = vsel %vm545_vm3, %v760_v23, %v766_v24 }
 0x57f   :  { %1775 = vmatmul.mubr.msk.bf16.vlgmr.msra.gmra.mrb[12].mxu1 %vm217_vm0, %v772_v27 }
 0x580   :  { %1779 = vmatpush3.bf16.msra.mxu1 %v1919_v55  ;;  %1782 = vmatprep.mubr.msk.bf16.mxu1 %vm217_vm0, %v2480_v5  ;;  %v1581_v5 = vld [vmem:[%s2620_s7] ss:$0 sm:$0xff]  ;;  %v1943_v55 = vld [vmem:[#allocation11 + $0x38] sm:$0xff]  }
 0x581   :  { %1780 = vmatprep.subr.bf16.mxu1 %v1920_v26 }
 0x584   :  { %1781 = vmatpush3.bf16.msra.mxu1 %v1920_v26 }
 0x585   :  { %1806 = vmatprep.subr.bf16.mxu1 %v2216_v31 }
 0x58b   :  { %1783 = vmatmul.mubr.msk.bf16.vlgmr.msra.gmra.mrb[12].mxu1 %vm217_vm0, %v2488_v8 }
 0x58c   :  { %1822 = vmatprep.mubr.msk.bf16.mxu1 %vm2217_vm1, %v2216_v31  ;;  %1807 = vmatpush3.bf16.msra.mxu1 %v1930_v30 }
 0x58d   :  { %1808 = vmatprep.subr.bf16.mxu1 %v2216_v31 }
 0x590   :  { %1809 = vmatpush3.bf16.msra.mxu1 %v1932_v46  ;;  %v1946_v46 = vld [vmem:[#allocation14 + $0x8] sm:$0xff]  }
 0x591   :  { %1810 = vmatprep.subr.bf16.mxu1 %v2216_v31 }
 0x594   :  { %1811 = vmatpush3.bf16.msra.mxu1 %v1934_v47  ;;  %v1948_v47 = vld [vmem:[#allocation14 + $0x18] sm:$0xff]  }
 0x595   :  { %1812 = vmatprep.subr.bf16.mxu1 %v2216_v31 }
 0x598   :  { %1813 = vmatpush3.bf16.msra.mxu1 %v1936_v49  ;;  %v1950_v49 = vld [vmem:[#allocation14 + $0x28] sm:$0xff]  }
 0x599   :  { %1814 = vmatprep.subr.bf16.mxu1 %v2216_v31 }
 0x59c   :  { %1815 = vmatpush3.bf16.msra.mxu1 %v1938_v51  ;;  %v1952_v51 = vld [vmem:[#allocation14 + $0x38] sm:$0xff]  }
 0x59d   :  { %1816 = vmatprep.subr.bf16.mxu1 %v2216_v31 }
 0x5a0   :  { %1817 = vmatpush3.bf16.msra.mxu1 %v1940_v6  ;;  %v1954_v6 = vld [vmem:[#allocation16 + $0x8] sm:$0xff]  }
 0x5a1   :  { %1818 = vmatprep.subr.bf16.mxu1 %v2216_v31 }
 0x5a4   :  { %1819 = vmatpush3.bf16.msra.mxu1 %v1942_v54  ;;  %v1956_v54 = vld [vmem:[#allocation16 + $0x18] sm:$0xff]  }
 0x5a5   :  { %1820 = vmatprep.subr.bf16.mxu1 %v2216_v31 }
 0x5a8   :  { %1821 = vmatpush3.bf16.msra.mxu1 %v1944_v4  ;;  %v1958_v4 = vld [vmem:[#allocation16 + $0x28] sm:$0xff]  }
 0x5a9   :  { %1846 = vmatprep.subr.bf16.mxu1 %v2216_v31 }
 0x65e   :  { %v1784_v8 = vpop.f32.mrb[12].mxu1 }
 0x65f   :  { %v916_v32 = vadd.f32 %v1784_v8, %v1581_v5  ;;  %v892_v33 = vpop.f32.mrb[13].mxu1 }
 0x660   :  { %v914_v34 = vadd.f32 %v1581_v5, %v892_v33  ;;  %v1785_v35 = vpop.f32.mrb[14].mxu1 }
 0x661   :  { %v917_v36 = vadd.f32 %v1785_v35, %v1581_v5  ;;  %v895_v37 = vpop.f32.mrb[15].mxu1  ;;  %v920_v39 = vmax.f32 %v916_v32, 0.0 }
 0x662   :  { %v915_v38 = vadd.f32 %v1581_v5, %v895_v37  ;;  %v918_v41 = vmax.f32 %v914_v34, 0.0 }
 0x663   :  { %v921_v40 = vmax.f32 %v917_v36, 0.0 }
 0x664   :  { %v919_v42 = vmax.f32 %v915_v38, 0.0 }
 0x665   :  { %v923_v43 = vpack.c.bf16 %v921_v40, %v920_v39 }
 0x666   :  { %v922_v44 = vpack.c.bf16 %v919_v42, %v918_v41 }
 0x668   :  { %1802 = vmatprep.mubr.bf16.mxu0 %v922_v44 }
 0x669   :  { %1803 = vmatmul.mubr.bf16.vlgmr.msra.gmra.mrb[20].mxu0 %v923_v43 }
 0x66a   :  { %1827 = vmatpush3.bf16.msra.mxu0 %v1929_v2  ;;  %1842 = vmatprep.mubr.msk.bf16.mxu0 %vm2217_vm1, %v2216_v31  ;;  %v1945_v2 = vld [vmem:[#allocation14] sm:$0xff]  }
 0x66b   :  { %1828 = vmatprep.subr.bf16.mxu0 %v2216_v31 }
 0x66e   :  { %1829 = vmatpush3.bf16.msra.mxu0 %v1931_v45 }
 0x66f   :  { %1830 = vmatprep.subr.bf16.mxu0 %v2216_v31 }
 0x672   :  { %1831 = vmatpush3.bf16.msra.mxu0 %v1933_v3  ;;  %v1947_v3 = vld [vmem:[#allocation14 + $0x10] sm:$0xff]  }
 0x673   :  { %1832 = vmatprep.subr.bf16.mxu0 %v2216_v31 }
 0x676   :  { %1833 = vmatpush3.bf16.msra.mxu0 %v1935_v48  ;;  %v1949_v48 = vld [vmem:[#allocation14 + $0x20] sm:$0xff]  }
 0x677   :  { %1834 = vmatprep.subr.bf16.mxu0 %v2216_v31 }
 0x67a   :  { %1835 = vmatpush3.bf16.msra.mxu0 %v1937_v50  ;;  %v1951_v50 = vld [vmem:[#allocation14 + $0x30] sm:$0xff]  }
 0x67b   :  { %1836 = vmatprep.subr.bf16.mxu0 %v2216_v31 }
 0x67e   :  { %1837 = vmatpush3.bf16.msra.mxu0 %v1939_v52  ;;  %v1953_v52 = vld [vmem:[#allocation16] sm:$0xff]  }
 0x67f   :  { %1838 = vmatprep.subr.bf16.mxu0 %v2216_v31 }
 0x682   :  { %1839 = vmatpush3.bf16.msra.mxu0 %v1941_v53  ;;  %v1955_v53 = vld [vmem:[#allocation16 + $0x10] sm:$0xff]  }
 0x683   :  { %1840 = vmatprep.subr.bf16.mxu0 %v2216_v31 }
 0x686   :  { %1841 = vmatpush3.bf16.msra.mxu0 %v1943_v55  ;;  %v1957_v55 = vld [vmem:[#allocation16 + $0x20] sm:$0xff]  }
 0x687   :  { %1866 = vmatprep.subr.bf16.mxu0 %v2216_v31 }
 0x73c   :  { %v1804_v57 = vpop.f32.mrb[20].mxu0 }
 0x73d   :  { %v1038_v58 = vadd.f32 %v1804_v57, %v1582_v56  ;;  %v1029_v59 = vpop.f32.mrb[21].mxu0 }
 0x73e   :  { %v1030_v60 = vadd.f32 %v1582_v56, %v1029_v59  ;;  %v1805_v61 = vpop.f32.mrb[22].mxu0  ;;  %v1607_v59 = vld [vmem:[%s2625_s12] ss:$0 sm:$0xff] }
 0x73f   :  { %v1046_v62 = vmax.f32 %v1038_v58, 0.0  ;;  %v1041_v63 = vadd.f32 %v1805_v61, %v1582_v56  ;;  %v1032_v0 = vpop.f32.mrb[23].mxu0 }
 0x740   :  { %v1044_v1 = vmax.f32 %v1030_v60, 0.0  ;;  %v1033_v7 = vadd.f32 %v1582_v56, %v1032_v0 }
 0x741   :  { %v1054_v9 = vrot.slane %v1046_v62, 4  ;;  %v1047_v10 = vmax.f32 %v1041_v63, 0.0 }
 0x742   :  { %v1048_v11 = vrot.slane %v1044_v1, 4  ;;  %v1045_v12 = vmax.f32 %v1033_v7, 0.0 }
 0x743   :  { %v1055_v13 = vadd.f32 %v1054_v9, %v1046_v62  ;;  %v1068_v14 = vrot.slane %v1047_v10, 4 }
 0x744   :  { %v1049_v15 = vadd.f32 %v1048_v11, %v1044_v1  ;;  %v1062_v16 = vrot.slane %v1045_v12, 4  ;;  %v1959_v11 = vld [vmem:[#allocation16 + $0x30] sm:$0xff]  }
 0x745   :  { %v1056_v17 = vrot.slane %v1055_v13, 2  ;;  %v1069_v18 = vadd.f32 %v1068_v14, %v1047_v10 }
 0x746   :  { %v1050_v19 = vrot.slane %v1049_v15, 2  ;;  %v1063_v20 = vadd.f32 %v1062_v16, %v1045_v12  ;;  %v1960_v12 = vld [vmem:[#allocation16 + $0x38] sm:$0xff]  }
 0x747   :  { %v1057_v21 = vadd.f32 %v1056_v17, %v1055_v13  ;;  %v1070_v22 = vrot.slane %v1069_v18, 2  ;;  %v1608_v13 = vld [vmem:[%s2627_s14] ss:$0 sm:$0xff]  ;;  %s2171_s14 = scalar_lea.vmem %s1541_s20, 32 }
 0x748   :  { %v1051_v23 = vadd.f32 %v1050_v19, %v1049_v15  ;;  %v1064_v24 = vrot.slane %v1063_v20, 2  ;;  %p2172_p2 = scmp.ne.s32.totalorder %s1541_s20, %s2171_s14  ;;  %p2177_p4 = scmp.lt.s32.totalorder %s2171_s14, %s2171_s14 }
 0x749   :  { %v1058_v25 = vrot.slane %v1057_v21, 1  ;;  %v1071_v26 = vadd.f32 %v1070_v22, %v1069_v18 }
 0x74a   :  { %v1052_v27 = vrot.slane %v1051_v23, 1  ;;  %v1065_v28 = vadd.f32 %v1064_v24, %v1063_v20  ;;  %p2178_p5 = por %p2177_p4, %p2176_p3 }
 0x74b   :  { %v1059_v29 = vadd.f32 %v1058_v25, %v1057_v21  ;;  %v1072_v30 = vrot.slane %v1071_v26, 1  ;;  %v1617_v21 = vld [vmem:[%s2629_s16] ss:$0 sm:$0xff] }
 0x74c   :  { %v1053_v5 = vadd.f32 %v1052_v27, %v1051_v23  ;;  %v1066_v8 = vrot.slane %v1065_v28, 1  ;;  %p2179_p6 = pnand %p2178_p5, %p2172_p2 }
 0x74d   :  { %v1061_v32 = vpack.c.bf16 %v1059_v29, %v1059_v29  ;;  %v1073_v33 = vadd.f32 %v1072_v30, %v1071_v26 }
 0x74e   :  { %v1060_v34 = vpack.c.bf16 %v1053_v5, %v1053_v5  ;;  %v1067_v35 = vadd.f32 %v1066_v8, %v1065_v28 }
 0x74f   :  { %v1207_v36 = vunpack.c.l.b16 %v1061_v32  ;;  %v1075_v37 = vpack.c.bf16 %v1073_v33, %v1073_v33 }
 0x750   :  { %v1206_v38 = vunpack.c.l.b16 %v1060_v34  ;;  %v1074_v39 = vpack.c.bf16 %v1067_v35, %v1067_v35 }
 0x751   :  { %v1111_v40 = vunpack.c.l.b16 %v1075_v37 }
 0x752   :  { %v1110_v41 = vunpack.c.l.b16 %v1074_v39  ;;  %v1208_v42 = vsel %vm1112_vm4, %v1207_v36, %v1206_v38 }
 0x753   :  { %v1209_v43 = vpack.c.b16 %v1208_v42, %v1208_v42 }
 0x754   :  { %v1113_v44 = vsel %vm1112_vm4, %v1111_v40, %v1110_v41 }
 0x755   :  { %1843 = vmatmul.mubr.bf16.vlgmr.msra.gmra.mrb[24].mxu0 %v1209_v43  ;;  %v1114_v45 = vpack.c.b16 %v1113_v44, %v1113_v44 }
 0x756   :  { %1882 = vmatprep.mubr.msk.bf16.mxu0 %vm2217_vm1, %v2216_v31  ;;  %1867 = vmatpush3.bf16.msra.mxu0 %v1953_v52 }
 0x757   :  { %1823 = vmatmul.mubr.bf16.vlgmr.msra.gmra.mrb[16].mxu1 %v1114_v45  ;;  %1868 = vmatprep.subr.bf16.mxu0 %v2216_v31 }
 0x758   :  { %1847 = vmatpush3.bf16.msra.mxu1 %v1945_v2  ;;  %1862 = vmatprep.mubr.msk.bf16.mxu1 %vm2217_vm1, %v2216_v31 }
 0x759   :  { %1848 = vmatprep.subr.bf16.mxu1 %v2216_v31 }
 0x75a   :  { %1869 = vmatpush3.bf16.msra.mxu0 %v1954_v6 }
 0x75b   :  { %1870 = vmatprep.subr.bf16.mxu0 %v2216_v31 }
 0x75c   :  { %1849 = vmatpush3.bf16.msra.mxu1 %v1946_v46 }
 0x75d   :  { %1850 = vmatprep.subr.bf16.mxu1 %v2216_v31 }
 0x75e   :  { %1871 = vmatpush3.bf16.msra.mxu0 %v1955_v53 }
 0x75f   :  { %1872 = vmatprep.subr.bf16.mxu0 %v2216_v31 }
 0x760   :  { %1851 = vmatpush3.bf16.msra.mxu1 %v1947_v3 }
 0x761   :  { %1852 = vmatprep.subr.bf16.mxu1 %v2216_v31 }
 0x762   :  { %1873 = vmatpush3.bf16.msra.mxu0 %v1956_v54 }
 0x763   :  { %1874 = vmatprep.subr.bf16.mxu0 %v2216_v31 }
 0x764   :  { %1853 = vmatpush3.bf16.msra.mxu1 %v1948_v47 }
 0x765   :  { %1854 = vmatprep.subr.bf16.mxu1 %v2216_v31 }
 0x766   :  { %1875 = vmatpush3.bf16.msra.mxu0 %v1957_v55 }
 0x767   :  { %1876 = vmatprep.subr.bf16.mxu0 %v2216_v31 }
 0x768   :  { %1855 = vmatpush3.bf16.msra.mxu1 %v1949_v48 }
 0x769   :  { %1856 = vmatprep.subr.bf16.mxu1 %v2216_v31 }
 0x76a   :  { %1877 = vmatpush3.bf16.msra.mxu0 %v1958_v4 }
 0x76b   :  { %1878 = vmatprep.subr.bf16.mxu0 %v2216_v31 }
 0x76c   :  { %1857 = vmatpush3.bf16.msra.mxu1 %v1950_v49 }
 0x76d   :  { %1858 = vmatprep.subr.bf16.mxu1 %v2216_v31 }
 0x76e   :  { %1879 = vmatpush3.bf16.msra.mxu0 %v1959_v11 }
 0x76f   :  { %1880 = vmatprep.subr.bf16.mxu0 %v2216_v31 }
 0x770   :  { %1859 = vmatpush3.bf16.msra.mxu1 %v1951_v50 }
 0x771   :  { %1860 = vmatprep.subr.bf16.mxu1 %v2216_v31 }
 0x772   :  { %1881 = vmatpush3.bf16.msra.mxu0 %v1960_v12 }
 0x774   :  { %1861 = vmatpush3.bf16.msra.mxu1 %v1952_v51 }
 0x828   :  { %v1293_v56 = vpop.f32.mrb[24].mxu0 }
 0x829   :  { %v1844_v57 = vpop.f32.mrb[25].mxu0 }
 0x82a   :  { %v1198_v58 = vpop.f32.mrb[16].mxu1  ;;  %v1296_v60 = vpop.f32.mrb[26].mxu0 }
 0x82b   :  { %v1294_v61 = vadd.f32 %v1293_v56, %v1198_v58  ;;  %v1824_v62 = vpop.f32.mrb[17].mxu1  ;;  %v1845_v63 = vpop.f32.mrb[27].mxu0 }
 0x82c   :  { %v1201_v0 = vpop.f32.mrb[18].mxu1 }
 0x82d   :  { %v1306_v1 = vadd.f32 %v1607_v59, %v1294_v61  ;;  %v1825_v7 = vpop.f32.mrb[19].mxu1 }
 0x82f   :  { %v1307_v9 = vmax.f32 %v1306_v1, 0.0 }
 0x831   :  { %v1308_v10 = vpack.c.bf16 %v1307_v9, %v1307_v9 }
 0x833   :  { %1863 = vmatmul.mubr.bf16.vlgmr.msra.gmra.mrb[20].mxu1 %v1308_v10 }
 0x906   :  { %v1414_v14 = vpop.f32.mrb[20].mxu1 }
 0x907   :  { %v1415_v15 = vadd.f32 %v1608_v13, %v1414_v14  ;;  %v1864_v16 = vpop.f32.mrb[21].mxu1 }
 0x908   :  { %v1417_v17 = vpop.f32.mrb[22].mxu1 }
 0x909   :  { %v1420_v18 = vmax.f32 %v1415_v15, 0.0  ;;  %v1865_v19 = vpop.f32.mrb[23].mxu1 }
 0x90b   :  { %v1421_v20 = vpack.c.bf16 %v1420_v18, %v1420_v18 }
 0x90d   :  { %1883 = vmatmul.mubr.bf16.vlgmr.msra.gmra.mrb[28].mxu0 %v1421_v20 }
 0x9e0   :  { %v1527_v31 = vpop.f32.mrb[28].mxu0 }
 0x9e1   :  { %v1528_v22 = vadd.f32 %v1617_v21, %v1527_v31  ;;  %v1884_v23 = vpop.f32.mrb[29].mxu0 }
 0x9e2   :  { %v1530_v24 = vpop.f32.mrb[30].mxu0 }
 0x9e3   :  { %1533 = vst [vmem:[#allocation17] sm:$0x3] %v1528_v22  ;;  %v1885_v25 = vpop.f32.mrb[31].mxu0 }
 0x9e4   :  { %2182 = shalt.err (!%p2179_p6)
}
 0x9e5   :  { %s2639_s3 = sld [smem:[#allocation26_spill]] }
 0x9eb   :  { %s2183_s16 = scalar_lea.hbm %s2639_s3, 32 }
 0x9ec   :  { %p2184_p7 = scmp.ne.s32.totalorder %s2639_s3, %s2183_s16  ;;  %p2187_p8 = scmp.lt.u32.totalorder %s2183_s16, %s2639_s3 }
 0x9ee   :  { %p2189_p9 = pnand %p2187_p8, %p2184_p7 }
 0x9f0   :  { %2192 = shalt.err (!%p2189_p9)
}
 0x9f1   :  { %1543 = dma.vmem_to_hbm [thread:$0]  %s1541_s20, 32, %s2639_s3, [#allocation4]  }
 0x9f2   :  { %2203 = dma.done.wait [#allocation4], 32  }
 0x9f3   :  { %2204 = vsyncadd [#allocation4], 4294967264 }
 0x9f4   :  { %1547 = vsyncpa [#allocation3], 1 }
 0x9f5   :  { %1548 = vsyncpa [#allocation6], 1 }
 0x9f6   :  { %1549 = vsyncpa [#allocation9], 1 }
 0x9f7   :  { %1550 = vsyncpa [#allocation12], 1 }
 0x9f8   :  { %1551 = vsyncpa [#allocation15], 1 }
 0x9f9   :  { %1552 = vsyncpa [#allocation4], 1 }

</bundles_post_ra>
